<compile_context>
chip_gen: v6e
topology: v6e:2x2x1
jax: 0.10.0
libtpu: 0.0.40
codegen_flags: <defaults>
</compile_context>

<pallas_src>
import functools

import jax
import jax.numpy as jnp
from jax import lax
from jax.experimental import pallas as pl
from jax.experimental.pallas import tpu as pltpu


def _deblur_kernel(r1_ref, m1_ref, m2_ref,
                   w1_ref, b1_ref, w2_ref, b2_ref, w3_ref, b3_ref,
                   o_ref,
                   pad2_ref, pad3_ref, r3_ref, *,
                   NB, F, K1, K3, S3, C1, C2, C3, W, Ho3,
                   FRM1o, FRM2, FRM3, FRM3o, SHIFT, L1, L3, W3):
    """Fused c1+relu -> c2+relu -> c3 for NB lane-concatenated images.

      r1_ref : (1, K1*S1, W1)   wrapper-built conv1 im2col (kh,cin on sublanes)
      w1_ref : (K1, C1, K1*S1)  conv1 weights, [kw, cout, kh*S1 + cin]
      w2_ref : (C2, C1)         1x1 conv weights
      w3_ref : (K3, C3, K3*S3)  conv3 weights, [kw, cout, kh*S3 + cin]
      m*_ref : (1, L*)          {0,1} column-validity masks
      o_ref  : (NB, C3, H*W)    lane-dense output
    """
    f32 = jnp.float32

    # ---- conv1: K1 MXU matmuls over the aligned im2col; kw folded into
    #      static lane shifts of the small (C1, .) results -------------------
    acc1 = jnp.zeros((C1, L1), f32)
    for kw in range(K1):
        p = jnp.dot(w1_ref[kw], r1_ref[0], preferred_element_type=f32)
        acc1 = acc1 + p[:, kw:kw + L1]
    a1 = jnp.maximum(acc1 + b1_ref[...], 0.0) * m1_ref[...]   # bias+ReLU+mask

    # ---- re-pad for conv2: zeroed frame + one shifted store per image ------
    pad2_ref[...] = jnp.zeros_like(pad2_ref)
    for nb in range(NB):
        pad2_ref[:, nb * FRM2 + SHIFT:nb * FRM2 + SHIFT + FRM1o] = (
            a1[:, nb * FRM1o:(nb + 1) * FRM1o])

    # ---- conv2 (1x1): a single matmul over the whole padded frame ----------
    acc2 = jnp.dot(w2_ref[...], pad2_ref[...], preferred_element_type=f32)
    a2 = jnp.maximum(acc2 + b2_ref[...], 0.0) * m2_ref[...]

    # ---- re-pad for conv3 ----------------------------------------------------
    pad3_ref[...] = jnp.zeros_like(pad3_ref)
    for nb in range(NB):
        pad3_ref[0:C2, nb * FRM3 + SHIFT:nb * FRM3 + SHIFT + FRM2] = (
            a2[:, nb * FRM2:(nb + 1) * FRM2])

    # ---- conv3: kh-stacked im2col strips + K3 matmuls + kw output shifts ----
    r3_ref[:, L3:W3] = jnp.zeros((K3 * S3, W3 - L3), f32)
    for nb in range(NB):
        for kh in range(K3):
            r3_ref[kh * S3:(kh + 1) * S3, nb * FRM3o:nb * FRM3o + FRM3o] = (
                pad3_ref[:, nb * FRM3 + kh * F:nb * FRM3 + kh * F + FRM3o])
    acc3 = jnp.zeros((C3, L3), f32)
    for kw in range(K3):
        p = jnp.dot(w3_ref[kw], r3_ref[...], preferred_element_type=f32)
        acc3 = acc3 + p[:, kw:kw + L3]
    out = (acc3 + b3_ref[...]).astype(o_ref.dtype)             # no ReLU on c3

    # ---- compact the F-stride frame rows into a lane-dense (C3, H*W) output -
    for nb in range(NB):
        for i in range(Ho3):
            o_ref[nb, :, i * W:(i + 1) * W] = (
                out[:, nb * FRM3o + i * F:nb * FRM3o + i * F + W])


def _round_up(n, m):
    return ((n + m - 1) // m) * m


def deblur_pallas(x_nchw, params, *, max_images_per_step=8):
    """x_nchw: (B, 3, H, W); params: ((w1,b1),(w2,b2),(w3,b3)) in OIHW/(C,)."""
    (w1, b1), (w2, b2), (w3, b3) = params
    B, Cin, H, W = x_nchw.shape
    C1, K1 = w1.shape[0], w1.shape[2]
    C2, K2 = w2.shape[0], w2.shape[2]
    C3, K3 = w3.shape[0], w3.shape[2]
    P = 2
    assert K2 == 1 and w1.shape[1] == Cin and w2.shape[1] == C1 and w3.shape[1] == C2

    # ---- static spatial bookkeeping (shared frame row stride F) -------------
    Hp1, Wp1 = H + 2 * P, W + 2 * P
    F = Wp1
    Ho1, Wo1 = Hp1 - K1 + 1, Wp1 - K1 + 1          # conv1 output grid
    Hp2, Wp2 = Ho1 + 2 * P, Wo1 + 2 * P
    Ho2, Wo2 = Hp2 - K2 + 1, Wp2 - K2 + 1          # conv2 output grid
    Hp3, Wp3 = Ho2 + 2 * P, Wo2 + 2 * P
    Ho3, Wo3 = Hp3 - K3 + 1, Wp3 - K3 + 1          # conv3 output grid == (H, W)
    assert Ho1 >= 1 and Wo1 >= 1 and Wp2 <= F and Wp3 <= F
    assert Ho3 == H and Wo3 == W

    S1 = _round_up(max(Cin, 1), 8)                 # conv1 im2col slab height
    S3 = _round_up(max(C2, 1), 8)                  # conv3 im2col slab height

    # ---- batch tiling: >= 2 grid steps when possible (v7x has 2 TCs),
    #      NB lane-concatenated images per step (capped for VMEM) -------------
    NSTEPS = 2 if (B >= 2 and B % 2 == 0) else 1
    while B // NSTEPS > max_images_per_step and B % (NSTEPS * 2) == 0:
        NSTEPS *= 2
    NB = B // NSTEPS

    FRM1o = Ho1 * F                                # per-image conv1-output extent
    FRM2 = Ho2 * F                                 # per-image conv2 frame extent
    FRM3 = Hp3 * F                                 # per-image conv3 padded frame
    FRM3o = Ho3 * F                                # per-image conv3-output extent
    SHIFT = P * F + P                              # re-padding lane shift
    L1, L3 = NB * FRM1o, NB * FRM3o
    W1 = _round_up(L1 + K1 - 1, 128)               # conv1 im2col lane width
    W3 = _round_up(L3 + K3 - 1, 128)               # conv3 im2col lane width

    f32 = jnp.float32
    x32 = x_nchw.astype(f32)

    # ---- wrapper-side: zero-pad + frame layout + conv1 im2col (tiny, fused) -
    xpad = jnp.pad(x32, ((0, 0), (0, S1 - Cin), (P, P), (P, P)))  # (B,S1,Hp1,F)
    r1 = jnp.stack([xpad[:, :, kh:kh + Ho1, :] for kh in range(K1)], axis=1)
    r1 = r1.reshape(B, K1 * S1, FRM1o)
    r1 = (r1.reshape(NSTEPS, NB, K1 * S1, FRM1o)
            .transpose(0, 2, 1, 3)
            .reshape(NSTEPS, K1 * S1, L1))
    r1 = jnp.pad(r1, ((0, 0), (0, 0), (0, W1 - L1)))

    # ---- {0,1} column-validity masks (precomputed, no in-kernel iota/mod) ---
    m1 = jnp.tile(((jnp.arange(FRM1o) % F) < Wo1).astype(f32), NB).reshape(1, L1)
    m2 = jnp.tile(((jnp.arange(FRM2) % F) < Wo2).astype(f32), NB).reshape(1, NB * FRM2)

    # ---- weight repacking: w[kw, co, kh*S + ci], ci zero-padded to S --------
    w1p = jnp.transpose(w1.astype(f32), (3, 0, 2, 1))
    w1p = jnp.pad(w1p, ((0, 0), (0, 0), (0, 0), (0, S1 - Cin))).reshape(K1, C1, K1 * S1)
    w2m = w2.astype(f32).reshape(C2, C1)
    w3p = jnp.transpose(w3.astype(f32), (3, 0, 2, 1))
    w3p = jnp.pad(w3p, ((0, 0), (0, 0), (0, 0), (0, S3 - C2))).reshape(K3, C3, K3 * S3)
    b1c = b1.astype(f32).reshape(C1, 1)
    b2c = b2.astype(f32).reshape(C2, 1)
    b3c = b3.astype(f32).reshape(C3, 1)

    kernel = functools.partial(
        _deblur_kernel,
        NB=NB, F=F, K1=K1, K3=K3, S3=S3, C1=C1, C2=C2, C3=C3, W=W, Ho3=Ho3,
        FRM1o=FRM1o, FRM2=FRM2, FRM3=FRM3, FRM3o=FRM3o, SHIFT=SHIFT,
        L1=L1, L3=L3, W3=W3)

    out_flat = pl.pallas_call(
        kernel,
        out_shape=jax.ShapeDtypeStruct((B, C3, Ho3 * Wo3), x_nchw.dtype),
        grid=(NSTEPS,),
        in_specs=[
            pl.BlockSpec((1, K1 * S1, W1), lambda s: (s, 0, 0)),   # conv1 im2col
            pl.BlockSpec((1, L1), lambda s: (0, 0)),               # mask 1
            pl.BlockSpec((1, NB * FRM2), lambda s: (0, 0)),        # mask 2
            pl.BlockSpec((K1, C1, K1 * S1), lambda s: (0, 0, 0)),  # w1
            pl.BlockSpec((C1, 1), lambda s: (0, 0)),               # b1
            pl.BlockSpec((C2, C1), lambda s: (0, 0)),              # w2
            pl.BlockSpec((C2, 1), lambda s: (0, 0)),               # b2
            pl.BlockSpec((K3, C3, K3 * S3), lambda s: (0, 0, 0)),  # w3
            pl.BlockSpec((C3, 1), lambda s: (0, 0)),               # b3
        ],
        out_specs=pl.BlockSpec((NB, C3, Ho3 * Wo3), lambda s: (s, 0, 0)),
        scratch_shapes=[
            pltpu.VMEM((C1, NB * FRM2), f32),      # layer-2 padded frame
            pltpu.VMEM((S3, NB * FRM3), f32),      # layer-3 padded frame
            pltpu.VMEM((K3 * S3, W3), f32),        # conv3 kh-stacked im2col
        ],
        compiler_params=pltpu.CompilerParams(
            dimension_semantics=("parallel",)),
    )(r1, m1, m2, w1p, b1c, w2m, b2c, w3p, b3c)

    return out_flat.reshape(B, C3, Ho3, Wo3)


deblur_pallas_jit = jax.jit(deblur_pallas)


def init_conv_params(key, cin, cout, k):
    """PyTorch-default-style init, OIHW weights: U(-1/sqrt(fan_in), +)."""
    kw_key, kb_key = jax.random.split(key)
    fan_in = cin * k * k
    bound = 1.0 / jnp.sqrt(jnp.float32(fan_in))
    w = jax.random.uniform(kw_key, (cout, cin, k, k), jnp.float32, -bound, bound)
    b = jax.random.uniform(kb_key, (cout,), jnp.float32, -bound, bound)
    return w, b


def deblur_reference(x_nchw, params):
    """Pure-JAX reference (lax.conv, NCHW/OIHW) for correctness check."""
    (w1, b1), (w2, b2), (w3, b3) = params
    dn = ("NCHW", "OIHW", "NCHW")

    def conv(x, w, b, pad):
        y = lax.conv_general_dilated(
            x, w, window_strides=(1, 1),
            padding=[(pad, pad), (pad, pad)],
            dimension_numbers=dn)
        return y + b.reshape(1, -1, 1, 1)

    x = jnp.maximum(conv(x_nchw, w1, b1, 2), 0.0)
    x = jnp.maximum(conv(x, w2, b2, 2), 0.0)
    return conv(x, w3, b3, 2)


if __name__ == "__main__":
    n_kernels = 8
    B, C, H, W = 2, 3, 16, 16

    root = jax.random.PRNGKey(0)
    k_x, k1, k2, k3 = jax.random.split(root, 4)

    x = jax.random.normal(k_x, (B, C, H, W), jnp.float32)      # NCHW like PyTorch
    params = (
        init_conv_params(k1, 3, n_kernels, 9),
        init_conv_params(k2, n_kernels, n_kernels // 2, 1),
        init_conv_params(k3, n_kernels // 2, 3, 5),
    )

    out = jax.block_until_ready(deblur_pallas_jit(x, params))
    ref = jax.block_until_ready(deblur_reference(x, params))

    assert out.shape == (B, 3, H, W), out.shape
    assert jnp.allclose(out, ref, atol=1e-4, rtol=1e-4), (
        float(jnp.max(jnp.abs(out - ref)))
    )
    print("KERNEL_OK")
</pallas_src>

<mosaic_0001>
module attributes {stable_mosaic.version = 11 : i64} {
  func.func @_deblur_kernel(%arg0: i32, %arg1: memref<1x72x256xf32, #tpu.memory_space<vmem>>, %arg2: memref<1x240xf32, #tpu.memory_space<vmem>>, %arg3: memref<1x320xf32, #tpu.memory_space<vmem>>, %arg4: memref<9x8x72xf32, #tpu.memory_space<vmem>>, %arg5: memref<8x1xf32, #tpu.memory_space<vmem>>, %arg6: memref<4x8xf32, #tpu.memory_space<vmem>>, %arg7: memref<4x1xf32, #tpu.memory_space<vmem>>, %arg8: memref<5x3x40xf32, #tpu.memory_space<vmem>>, %arg9: memref<3x1xf32, #tpu.memory_space<vmem>>, %arg10: memref<1x3x256xf32, #tpu.memory_space<vmem>>, %arg11: memref<8x320xf32, #tpu.memory_space<vmem>>, %arg12: memref<8x400xf32, #tpu.memory_space<vmem>>, %arg13: memref<40x384xf32, #tpu.memory_space<vmem>>) attributes {dimension_semantics = [#tpu.dimension_semantics<parallel>], iteration_bounds = array<i64: 2>, scalar_prefetch = 0 : i64, scratch_operands = 3 : i64, tpu.core_type = #tpu.core_type<tc>, window_params = [{transform_indices = @transform_0, window_bounds = array<i64: 1, 72, 256>}, {pipeline_mode = #tpu.pipeline_mode<synchronous>, transform_indices = @transform_1, window_bounds = array<i64: 1, 240>}, {pipeline_mode = #tpu.pipeline_mode<synchronous>, transform_indices = @transform_2, window_bounds = array<i64: 1, 320>}, {pipeline_mode = #tpu.pipeline_mode<synchronous>, transform_indices = @transform_3, window_bounds = array<i64: 9, 8, 72>}, {pipeline_mode = #tpu.pipeline_mode<synchronous>, transform_indices = @transform_4, window_bounds = array<i64: 8, 1>}, {pipeline_mode = #tpu.pipeline_mode<synchronous>, transform_indices = @transform_5, window_bounds = array<i64: 4, 8>}, {pipeline_mode = #tpu.pipeline_mode<synchronous>, transform_indices = @transform_6, window_bounds = array<i64: 4, 1>}, {pipeline_mode = #tpu.pipeline_mode<synchronous>, transform_indices = @transform_7, window_bounds = array<i64: 5, 3, 40>}, {pipeline_mode = #tpu.pipeline_mode<synchronous>, transform_indices = @transform_8, window_bounds = array<i64: 3, 1>}, {transform_indices = @transform_9, window_bounds = array<i64: 1, 3, 256>}]} {
    %cst = arith.constant 0.000000e+00 : f32
    %0 = vector.broadcast %cst : f32 to vector<8x240xf32>
    %c0 = arith.constant 0 : index
    %c0_0 = arith.constant 0 : index
    %c0_1 = arith.constant 0 : index
    %1 = vector.load %arg4[%c0, %c0_0, %c0_1] : memref<9x8x72xf32, #tpu.memory_space<vmem>>, vector<1x8x72xf32>
    %2 = vector.shape_cast %1 : vector<1x8x72xf32> to vector<8x72xf32>
    %c0_2 = arith.constant 0 : index
    %c0_3 = arith.constant 0 : index
    %c0_4 = arith.constant 0 : index
    %3 = vector.load %arg1[%c0_2, %c0_3, %c0_4] : memref<1x72x256xf32, #tpu.memory_space<vmem>>, vector<1x72x256xf32>
    %4 = vector.shape_cast %3 : vector<1x72x256xf32> to vector<72x256xf32>
    %cst_5 = arith.constant dense<0.000000e+00> : vector<8x256xf32>
    %5 = tpu.matmul %2, %4, %cst_5 {dimension_numbers = #tpu.dot_dimension_numbers<[1], [0], [0], [1], [0, 0, 1, 1], [], []>} : vector<8x72xf32>, vector<72x256xf32>, vector<8x256xf32> -> vector<8x256xf32>
    %6 = vector.extract_strided_slice %5 {offsets = [0, 0], sizes = [8, 240], strides = [1, 1]} : vector<8x256xf32> to vector<8x240xf32>
    %7 = arith.addf %0, %6 : vector<8x240xf32>
    %c1 = arith.constant 1 : index
    %c0_6 = arith.constant 0 : index
    %c0_7 = arith.constant 0 : index
    %8 = vector.load %arg4[%c1, %c0_6, %c0_7] : memref<9x8x72xf32, #tpu.memory_space<vmem>>, vector<1x8x72xf32>
    %9 = vector.shape_cast %8 : vector<1x8x72xf32> to vector<8x72xf32>
    %c0_8 = arith.constant 0 : index
    %c0_9 = arith.constant 0 : index
    %c0_10 = arith.constant 0 : index
    %10 = vector.load %arg1[%c0_8, %c0_9, %c0_10] : memref<1x72x256xf32, #tpu.memory_space<vmem>>, vector<1x72x256xf32>
    %11 = vector.shape_cast %10 : vector<1x72x256xf32> to vector<72x256xf32>
    %cst_11 = arith.constant dense<0.000000e+00> : vector<8x256xf32>
    %12 = tpu.matmul %9, %11, %cst_11 {dimension_numbers = #tpu.dot_dimension_numbers<[1], [0], [0], [1], [0, 0, 1, 1], [], []>} : vector<8x72xf32>, vector<72x256xf32>, vector<8x256xf32> -> vector<8x256xf32>
    %13 = vector.extract_strided_slice %12 {offsets = [0, 1], sizes = [8, 240], strides = [1, 1]} : vector<8x256xf32> to vector<8x240xf32>
    %14 = arith.addf %7, %13 : vector<8x240xf32>
    %c2 = arith.constant 2 : index
    %c0_12 = arith.constant 0 : index
    %c0_13 = arith.constant 0 : index
    %15 = vector.load %arg4[%c2, %c0_12, %c0_13] : memref<9x8x72xf32, #tpu.memory_space<vmem>>, vector<1x8x72xf32>
    %16 = vector.shape_cast %15 : vector<1x8x72xf32> to vector<8x72xf32>
    %c0_14 = arith.constant 0 : index
    %c0_15 = arith.constant 0 : index
    %c0_16 = arith.constant 0 : index
    %17 = vector.load %arg1[%c0_14, %c0_15, %c0_16] : memref<1x72x256xf32, #tpu.memory_space<vmem>>, vector<1x72x256xf32>
    %18 = vector.shape_cast %17 : vector<1x72x256xf32> to vector<72x256xf32>
    %cst_17 = arith.constant dense<0.000000e+00> : vector<8x256xf32>
    %19 = tpu.matmul %16, %18, %cst_17 {dimension_numbers = #tpu.dot_dimension_numbers<[1], [0], [0], [1], [0, 0, 1, 1], [], []>} : vector<8x72xf32>, vector<72x256xf32>, vector<8x256xf32> -> vector<8x256xf32>
    %20 = vector.extract_strided_slice %19 {offsets = [0, 2], sizes = [8, 240], strides = [1, 1]} : vector<8x256xf32> to vector<8x240xf32>
    %21 = arith.addf %14, %20 : vector<8x240xf32>
    %c3 = arith.constant 3 : index
    %c0_18 = arith.constant 0 : index
    %c0_19 = arith.constant 0 : index
    %22 = vector.load %arg4[%c3, %c0_18, %c0_19] : memref<9x8x72xf32, #tpu.memory_space<vmem>>, vector<1x8x72xf32>
    %23 = vector.shape_cast %22 : vector<1x8x72xf32> to vector<8x72xf32>
    %c0_20 = arith.constant 0 : index
    %c0_21 = arith.constant 0 : index
    %c0_22 = arith.constant 0 : index
    %24 = vector.load %arg1[%c0_20, %c0_21, %c0_22] : memref<1x72x256xf32, #tpu.memory_space<vmem>>, vector<1x72x256xf32>
    %25 = vector.shape_cast %24 : vector<1x72x256xf32> to vector<72x256xf32>
    %cst_23 = arith.constant dense<0.000000e+00> : vector<8x256xf32>
    %26 = tpu.matmul %23, %25, %cst_23 {dimension_numbers = #tpu.dot_dimension_numbers<[1], [0], [0], [1], [0, 0, 1, 1], [], []>} : vector<8x72xf32>, vector<72x256xf32>, vector<8x256xf32> -> vector<8x256xf32>
    %27 = vector.extract_strided_slice %26 {offsets = [0, 3], sizes = [8, 240], strides = [1, 1]} : vector<8x256xf32> to vector<8x240xf32>
    %28 = arith.addf %21, %27 : vector<8x240xf32>
    %c4 = arith.constant 4 : index
    %c0_24 = arith.constant 0 : index
    %c0_25 = arith.constant 0 : index
    %29 = vector.load %arg4[%c4, %c0_24, %c0_25] : memref<9x8x72xf32, #tpu.memory_space<vmem>>, vector<1x8x72xf32>
    %30 = vector.shape_cast %29 : vector<1x8x72xf32> to vector<8x72xf32>
    %c0_26 = arith.constant 0 : index
    %c0_27 = arith.constant 0 : index
    %c0_28 = arith.constant 0 : index
    %31 = vector.load %arg1[%c0_26, %c0_27, %c0_28] : memref<1x72x256xf32, #tpu.memory_space<vmem>>, vector<1x72x256xf32>
    %32 = vector.shape_cast %31 : vector<1x72x256xf32> to vector<72x256xf32>
    %cst_29 = arith.constant dense<0.000000e+00> : vector<8x256xf32>
    %33 = tpu.matmul %30, %32, %cst_29 {dimension_numbers = #tpu.dot_dimension_numbers<[1], [0], [0], [1], [0, 0, 1, 1], [], []>} : vector<8x72xf32>, vector<72x256xf32>, vector<8x256xf32> -> vector<8x256xf32>
    %34 = vector.extract_strided_slice %33 {offsets = [0, 4], sizes = [8, 240], strides = [1, 1]} : vector<8x256xf32> to vector<8x240xf32>
    %35 = arith.addf %28, %34 : vector<8x240xf32>
    %c5 = arith.constant 5 : index
    %c0_30 = arith.constant 0 : index
    %c0_31 = arith.constant 0 : index
    %36 = vector.load %arg4[%c5, %c0_30, %c0_31] : memref<9x8x72xf32, #tpu.memory_space<vmem>>, vector<1x8x72xf32>
    %37 = vector.shape_cast %36 : vector<1x8x72xf32> to vector<8x72xf32>
    %c0_32 = arith.constant 0 : index
    %c0_33 = arith.constant 0 : index
    %c0_34 = arith.constant 0 : index
    %38 = vector.load %arg1[%c0_32, %c0_33, %c0_34] : memref<1x72x256xf32, #tpu.memory_space<vmem>>, vector<1x72x256xf32>
    %39 = vector.shape_cast %38 : vector<1x72x256xf32> to vector<72x256xf32>
    %cst_35 = arith.constant dense<0.000000e+00> : vector<8x256xf32>
    %40 = tpu.matmul %37, %39, %cst_35 {dimension_numbers = #tpu.dot_dimension_numbers<[1], [0], [0], [1], [0, 0, 1, 1], [], []>} : vector<8x72xf32>, vector<72x256xf32>, vector<8x256xf32> -> vector<8x256xf32>
    %41 = vector.extract_strided_slice %40 {offsets = [0, 5], sizes = [8, 240], strides = [1, 1]} : vector<8x256xf32> to vector<8x240xf32>
    %42 = arith.addf %35, %41 : vector<8x240xf32>
    %c6 = arith.constant 6 : index
    %c0_36 = arith.constant 0 : index
    %c0_37 = arith.constant 0 : index
    %43 = vector.load %arg4[%c6, %c0_36, %c0_37] : memref<9x8x72xf32, #tpu.memory_space<vmem>>, vector<1x8x72xf32>
    %44 = vector.shape_cast %43 : vector<1x8x72xf32> to vector<8x72xf32>
    %c0_38 = arith.constant 0 : index
    %c0_39 = arith.constant 0 : index
    %c0_40 = arith.constant 0 : index
    %45 = vector.load %arg1[%c0_38, %c0_39, %c0_40] : memref<1x72x256xf32, #tpu.memory_space<vmem>>, vector<1x72x256xf32>
    %46 = vector.shape_cast %45 : vector<1x72x256xf32> to vector<72x256xf32>
    %cst_41 = arith.constant dense<0.000000e+00> : vector<8x256xf32>
    %47 = tpu.matmul %44, %46, %cst_41 {dimension_numbers = #tpu.dot_dimension_numbers<[1], [0], [0], [1], [0, 0, 1, 1], [], []>} : vector<8x72xf32>, vector<72x256xf32>, vector<8x256xf32> -> vector<8x256xf32>
    %48 = vector.extract_strided_slice %47 {offsets = [0, 6], sizes = [8, 240], strides = [1, 1]} : vector<8x256xf32> to vector<8x240xf32>
    %49 = arith.addf %42, %48 : vector<8x240xf32>
    %c7 = arith.constant 7 : index
    %c0_42 = arith.constant 0 : index
    %c0_43 = arith.constant 0 : index
    %50 = vector.load %arg4[%c7, %c0_42, %c0_43] : memref<9x8x72xf32, #tpu.memory_space<vmem>>, vector<1x8x72xf32>
    %51 = vector.shape_cast %50 : vector<1x8x72xf32> to vector<8x72xf32>
    %c0_44 = arith.constant 0 : index
    %c0_45 = arith.constant 0 : index
    %c0_46 = arith.constant 0 : index
    %52 = vector.load %arg1[%c0_44, %c0_45, %c0_46] : memref<1x72x256xf32, #tpu.memory_space<vmem>>, vector<1x72x256xf32>
    %53 = vector.shape_cast %52 : vector<1x72x256xf32> to vector<72x256xf32>
    %cst_47 = arith.constant dense<0.000000e+00> : vector<8x256xf32>
    %54 = tpu.matmul %51, %53, %cst_47 {dimension_numbers = #tpu.dot_dimension_numbers<[1], [0], [0], [1], [0, 0, 1, 1], [], []>} : vector<8x72xf32>, vector<72x256xf32>, vector<8x256xf32> -> vector<8x256xf32>
    %55 = vector.extract_strided_slice %54 {offsets = [0, 7], sizes = [8, 240], strides = [1, 1]} : vector<8x256xf32> to vector<8x240xf32>
    %56 = arith.addf %49, %55 : vector<8x240xf32>
    %c8 = arith.constant 8 : index
    %c0_48 = arith.constant 0 : index
    %c0_49 = arith.constant 0 : index
    %57 = vector.load %arg4[%c8, %c0_48, %c0_49] : memref<9x8x72xf32, #tpu.memory_space<vmem>>, vector<1x8x72xf32>
    %58 = vector.shape_cast %57 : vector<1x8x72xf32> to vector<8x72xf32>
    %c0_50 = arith.constant 0 : index
    %c0_51 = arith.constant 0 : index
    %c0_52 = arith.constant 0 : index
    %59 = vector.load %arg1[%c0_50, %c0_51, %c0_52] : memref<1x72x256xf32, #tpu.memory_space<vmem>>, vector<1x72x256xf32>
    %60 = vector.shape_cast %59 : vector<1x72x256xf32> to vector<72x256xf32>
    %cst_53 = arith.constant dense<0.000000e+00> : vector<8x256xf32>
    %61 = tpu.matmul %58, %60, %cst_53 {dimension_numbers = #tpu.dot_dimension_numbers<[1], [0], [0], [1], [0, 0, 1, 1], [], []>} : vector<8x72xf32>, vector<72x256xf32>, vector<8x256xf32> -> vector<8x256xf32>
    %62 = vector.extract_strided_slice %61 {offsets = [0, 8], sizes = [8, 240], strides = [1, 1]} : vector<8x256xf32> to vector<8x240xf32>
    %63 = arith.addf %56, %62 : vector<8x240xf32>
    %c0_54 = arith.constant 0 : index
    %c0_55 = arith.constant 0 : index
    %64 = vector.load %arg5[%c0_54, %c0_55] : memref<8x1xf32, #tpu.memory_space<vmem>>, vector<8x1xf32>
    %65 = vector.broadcast %64 : vector<8x1xf32> to vector<8x240xf32>
    %66 = arith.addf %63, %65 : vector<8x240xf32>
    %cst_56 = arith.constant 0.000000e+00 : f32
    %67 = vector.broadcast %cst_56 : f32 to vector<8x240xf32>
    %68 = arith.maximumf %66, %67 : vector<8x240xf32>
    %c0_57 = arith.constant 0 : index
    %c0_58 = arith.constant 0 : index
    %69 = vector.load %arg2[%c0_57, %c0_58] : memref<1x240xf32, #tpu.memory_space<vmem>>, vector<1x240xf32>
    %70 = vector.broadcast %69 : vector<1x240xf32> to vector<8x240xf32>
    %71 = arith.mulf %68, %70 : vector<8x240xf32>
    %cst_59 = arith.constant 0.000000e+00 : f32
    %72 = vector.broadcast %cst_59 : f32 to vector<8x320xf32>
    %c0_60 = arith.constant 0 : index
    %c0_61 = arith.constant 0 : index
    %73 = vector.load %arg11[%c0_60, %c0_61] : memref<8x320xf32, #tpu.memory_space<vmem>>, vector<8x320xf32>
    tpu.vector_store %arg11[%c0_60, %c0_61], %72 {strides = array<i32>} : memref<8x320xf32, #tpu.memory_space<vmem>>, vector<8x320xf32>,
    %c0_62 = arith.constant 0 : index
    %c42 = arith.constant 42 : index
    %74 = vector.load %arg11[%c0_62, %c42] : memref<8x320xf32, #tpu.memory_space<vmem>>, vector<8x240xf32>
    tpu.vector_store %arg11[%c0_62, %c42], %71 {strides = array<i32>} : memref<8x320xf32, #tpu.memory_space<vmem>>, vector<8x240xf32>,
    %c0_63 = arith.constant 0 : index
    %c0_64 = arith.constant 0 : index
    %75 = vector.load %arg6[%c0_63, %c0_64] : memref<4x8xf32, #tpu.memory_space<vmem>>, vector<4x8xf32>
    %c0_65 = arith.constant 0 : index
    %c0_66 = arith.constant 0 : index
    %76 = vector.load %arg11[%c0_65, %c0_66] : memref<8x320xf32, #tpu.memory_space<vmem>>, vector<8x320xf32>
    %cst_67 = arith.constant dense<0.000000e+00> : vector<4x320xf32>
    %77 = tpu.matmul %75, %76, %cst_67 {dimension_numbers = #tpu.dot_dimension_numbers<[1], [0], [0], [1], [0, 0, 1, 1], [], []>} : vector<4x8xf32>, vector<8x320xf32>, vector<4x320xf32> -> vector<4x320xf32>
    %c0_68 = arith.constant 0 : index
    %c0_69 = arith.constant 0 : index
    %78 = vector.load %arg7[%c0_68, %c0_69] : memref<4x1xf32, #tpu.memory_space<vmem>>, vector<4x1xf32>
    %79 = vector.broadcast %78 : vector<4x1xf32> to vector<4x320xf32>
    %80 = arith.addf %77, %79 : vector<4x320xf32>
    %cst_70 = arith.constant 0.000000e+00 : f32
    %81 = vector.broadcast %cst_70 : f32 to vector<4x320xf32>
    %82 = arith.maximumf %80, %81 : vector<4x320xf32>
    %c0_71 = arith.constant 0 : index
    %c0_72 = arith.constant 0 : index
    %83 = vector.load %arg3[%c0_71, %c0_72] : memref<1x320xf32, #tpu.memory_space<vmem>>, vector<1x320xf32>
    %84 = vector.broadcast %83 : vector<1x320xf32> to vector<4x320xf32>
    %85 = arith.mulf %82, %84 : vector<4x320xf32>
    %cst_73 = arith.constant 0.000000e+00 : f32
    %86 = vector.broadcast %cst_73 : f32 to vector<8x400xf32>
    %c0_74 = arith.constant 0 : index
    %c0_75 = arith.constant 0 : index
    %87 = vector.load %arg12[%c0_74, %c0_75] : memref<8x400xf32, #tpu.memory_space<vmem>>, vector<8x400xf32>
    tpu.vector_store %arg12[%c0_74, %c0_75], %86 {strides = array<i32>} : memref<8x400xf32, #tpu.memory_space<vmem>>, vector<8x400xf32>,
    %c0_76 = arith.constant 0 : index
    %c42_77 = arith.constant 42 : index
    %88 = vector.load %arg12[%c0_76, %c42_77] : memref<8x400xf32, #tpu.memory_space<vmem>>, vector<4x320xf32>
    tpu.vector_store %arg12[%c0_76, %c42_77], %85 {strides = array<i32>} : memref<8x400xf32, #tpu.memory_space<vmem>>, vector<4x320xf32>,
    %cst_78 = arith.constant 0.000000e+00 : f32
    %89 = vector.broadcast %cst_78 : f32 to vector<40x64xf32>
    %c0_79 = arith.constant 0 : index
    %c320 = arith.constant 320 : index
    %90 = vector.load %arg13[%c0_79, %c320] : memref<40x384xf32, #tpu.memory_space<vmem>>, vector<40x64xf32>
    tpu.vector_store %arg13[%c0_79, %c320], %89 {strides = array<i32>} : memref<40x384xf32, #tpu.memory_space<vmem>>, vector<40x64xf32>,
    %c0_80 = arith.constant 0 : index
    %c0_81 = arith.constant 0 : index
    %91 = vector.load %arg12[%c0_80, %c0_81] : memref<8x400xf32, #tpu.memory_space<vmem>>, vector<8x320xf32>
    %c0_82 = arith.constant 0 : index
    %c0_83 = arith.constant 0 : index
    %92 = vector.load %arg13[%c0_82, %c0_83] : memref<40x384xf32, #tpu.memory_space<vmem>>, vector<8x320xf32>
    tpu.vector_store %arg13[%c0_82, %c0_83], %91 {strides = array<i32>} : memref<40x384xf32, #tpu.memory_space<vmem>>, vector<8x320xf32>,
    %c0_84 = arith.constant 0 : index
    %c20 = arith.constant 20 : index
    %93 = vector.load %arg12[%c0_84, %c20] : memref<8x400xf32, #tpu.memory_space<vmem>>, vector<8x320xf32>
    %c8_85 = arith.constant 8 : index
    %c0_86 = arith.constant 0 : index
    %94 = vector.load %arg13[%c8_85, %c0_86] : memref<40x384xf32, #tpu.memory_space<vmem>>, vector<8x320xf32>
    tpu.vector_store %arg13[%c8_85, %c0_86], %93 {strides = array<i32>} : memref<40x384xf32, #tpu.memory_space<vmem>>, vector<8x320xf32>,
    %c0_87 = arith.constant 0 : index
    %c40 = arith.constant 40 : index
    %95 = vector.load %arg12[%c0_87, %c40] : memref<8x400xf32, #tpu.memory_space<vmem>>, vector<8x320xf32>
    %c16 = arith.constant 16 : index
    %c0_88 = arith.constant 0 : index
    %96 = vector.load %arg13[%c16, %c0_88] : memref<40x384xf32, #tpu.memory_space<vmem>>, vector<8x320xf32>
    tpu.vector_store %arg13[%c16, %c0_88], %95 {strides = array<i32>} : memref<40x384xf32, #tpu.memory_space<vmem>>, vector<8x320xf32>,
    %c0_89 = arith.constant 0 : index
    %c60 = arith.constant 60 : index
    %97 = vector.load %arg12[%c0_89, %c60] : memref<8x400xf32, #tpu.memory_space<vmem>>, vector<8x320xf32>
    %c24 = arith.constant 24 : index
    %c0_90 = arith.constant 0 : index
    %98 = vector.load %arg13[%c24, %c0_90] : memref<40x384xf32, #tpu.memory_space<vmem>>, vector<8x320xf32>
    tpu.vector_store %arg13[%c24, %c0_90], %97 {strides = array<i32>} : memref<40x384xf32, #tpu.memory_space<vmem>>, vector<8x320xf32>,
    %c0_91 = arith.constant 0 : index
    %c80 = arith.constant 80 : index
    %99 = vector.load %arg12[%c0_91, %c80] : memref<8x400xf32, #tpu.memory_space<vmem>>, vector<8x320xf32>
    %c32 = arith.constant 32 : index
    %c0_92 = arith.constant 0 : index
    %100 = vector.load %arg13[%c32, %c0_92] : memref<40x384xf32, #tpu.memory_space<vmem>>, vector<8x320xf32>
    tpu.vector_store %arg13[%c32, %c0_92], %99 {strides = array<i32>} : memref<40x384xf32, #tpu.memory_space<vmem>>, vector<8x320xf32>,
    %cst_93 = arith.constant 0.000000e+00 : f32
    %101 = vector.broadcast %cst_93 : f32 to vector<3x320xf32>
    %c0_94 = arith.constant 0 : index
    %c0_95 = arith.constant 0 : index
    %c0_96 = arith.constant 0 : index
    %102 = vector.load %arg8[%c0_94, %c0_95, %c0_96] : memref<5x3x40xf32, #tpu.memory_space<vmem>>, vector<1x3x40xf32>
    %103 = vector.shape_cast %102 : vector<1x3x40xf32> to vector<3x40xf32>
    %c0_97 = arith.constant 0 : index
    %c0_98 = arith.constant 0 : index
    %104 = vector.load %arg13[%c0_97, %c0_98] : memref<40x384xf32, #tpu.memory_space<vmem>>, vector<40x384xf32>
    %cst_99 = arith.constant dense<0.000000e+00> : vector<3x384xf32>
    %105 = tpu.matmul %103, %104, %cst_99 {dimension_numbers = #tpu.dot_dimension_numbers<[1], [0], [0], [1], [0, 0, 1, 1], [], []>} : vector<3x40xf32>, vector<40x384xf32>, vector<3x384xf32> -> vector<3x384xf32>
    %106 = vector.extract_strided_slice %105 {offsets = [0, 0], sizes = [3, 320], strides = [1, 1]} : vector<3x384xf32> to vector<3x320xf32>
    %107 = arith.addf %101, %106 : vector<3x320xf32>
    %c1_100 = arith.constant 1 : index
    %c0_101 = arith.constant 0 : index
    %c0_102 = arith.constant 0 : index
    %108 = vector.load %arg8[%c1_100, %c0_101, %c0_102] : memref<5x3x40xf32, #tpu.memory_space<vmem>>, vector<1x3x40xf32>
    %109 = vector.shape_cast %108 : vector<1x3x40xf32> to vector<3x40xf32>
    %c0_103 = arith.constant 0 : index
    %c0_104 = arith.constant 0 : index
    %110 = vector.load %arg13[%c0_103, %c0_104] : memref<40x384xf32, #tpu.memory_space<vmem>>, vector<40x384xf32>
    %cst_105 = arith.constant dense<0.000000e+00> : vector<3x384xf32>
    %111 = tpu.matmul %109, %110, %cst_105 {dimension_numbers = #tpu.dot_dimension_numbers<[1], [0], [0], [1], [0, 0, 1, 1], [], []>} : vector<3x40xf32>, vector<40x384xf32>, vector<3x384xf32> -> vector<3x384xf32>
    %112 = vector.extract_strided_slice %111 {offsets = [0, 1], sizes = [3, 320], strides = [1, 1]} : vector<3x384xf32> to vector<3x320xf32>
    %113 = arith.addf %107, %112 : vector<3x320xf32>
    %c2_106 = arith.constant 2 : index
    %c0_107 = arith.constant 0 : index
    %c0_108 = arith.constant 0 : index
    %114 = vector.load %arg8[%c2_106, %c0_107, %c0_108] : memref<5x3x40xf32, #tpu.memory_space<vmem>>, vector<1x3x40xf32>
    %115 = vector.shape_cast %114 : vector<1x3x40xf32> to vector<3x40xf32>
    %c0_109 = arith.constant 0 : index
    %c0_110 = arith.constant 0 : index
    %116 = vector.load %arg13[%c0_109, %c0_110] : memref<40x384xf32, #tpu.memory_space<vmem>>, vector<40x384xf32>
    %cst_111 = arith.constant dense<0.000000e+00> : vector<3x384xf32>
    %117 = tpu.matmul %115, %116, %cst_111 {dimension_numbers = #tpu.dot_dimension_numbers<[1], [0], [0], [1], [0, 0, 1, 1], [], []>} : vector<3x40xf32>, vector<40x384xf32>, vector<3x384xf32> -> vector<3x384xf32>
    %118 = vector.extract_strided_slice %117 {offsets = [0, 2], sizes = [3, 320], strides = [1, 1]} : vector<3x384xf32> to vector<3x320xf32>
    %119 = arith.addf %113, %118 : vector<3x320xf32>
    %c3_112 = arith.constant 3 : index
    %c0_113 = arith.constant 0 : index
    %c0_114 = arith.constant 0 : index
    %120 = vector.load %arg8[%c3_112, %c0_113, %c0_114] : memref<5x3x40xf32, #tpu.memory_space<vmem>>, vector<1x3x40xf32>
    %121 = vector.shape_cast %120 : vector<1x3x40xf32> to vector<3x40xf32>
    %c0_115 = arith.constant 0 : index
    %c0_116 = arith.constant 0 : index
    %122 = vector.load %arg13[%c0_115, %c0_116] : memref<40x384xf32, #tpu.memory_space<vmem>>, vector<40x384xf32>
    %cst_117 = arith.constant dense<0.000000e+00> : vector<3x384xf32>
    %123 = tpu.matmul %121, %122, %cst_117 {dimension_numbers = #tpu.dot_dimension_numbers<[1], [0], [0], [1], [0, 0, 1, 1], [], []>} : vector<3x40xf32>, vector<40x384xf32>, vector<3x384xf32> -> vector<3x384xf32>
    %124 = vector.extract_strided_slice %123 {offsets = [0, 3], sizes = [3, 320], strides = [1, 1]} : vector<3x384xf32> to vector<3x320xf32>
    %125 = arith.addf %119, %124 : vector<3x320xf32>
    %c4_118 = arith.constant 4 : index
    %c0_119 = arith.constant 0 : index
    %c0_120 = arith.constant 0 : index
    %126 = vector.load %arg8[%c4_118, %c0_119, %c0_120] : memref<5x3x40xf32, #tpu.memory_space<vmem>>, vector<1x3x40xf32>
    %127 = vector.shape_cast %126 : vector<1x3x40xf32> to vector<3x40xf32>
    %c0_121 = arith.constant 0 : index
    %c0_122 = arith.constant 0 : index
    %128 = vector.load %arg13[%c0_121, %c0_122] : memref<40x384xf32, #tpu.memory_space<vmem>>, vector<40x384xf32>
    %cst_123 = arith.constant dense<0.000000e+00> : vector<3x384xf32>
    %129 = tpu.matmul %127, %128, %cst_123 {dimension_numbers = #tpu.dot_dimension_numbers<[1], [0], [0], [1], [0, 0, 1, 1], [], []>} : vector<3x40xf32>, vector<40x384xf32>, vector<3x384xf32> -> vector<3x384xf32>
    %130 = vector.extract_strided_slice %129 {offsets = [0, 4], sizes = [3, 320], strides = [1, 1]} : vector<3x384xf32> to vector<3x320xf32>
    %131 = arith.addf %125, %130 : vector<3x320xf32>
    %c0_124 = arith.constant 0 : index
    %c0_125 = arith.constant 0 : index
    %132 = vector.load %arg9[%c0_124, %c0_125] : memref<3x1xf32, #tpu.memory_space<vmem>>, vector<3x1xf32>
    %133 = vector.broadcast %132 : vector<3x1xf32> to vector<3x320xf32>
    %134 = arith.addf %131, %133 : vector<3x320xf32>
    %135 = vector.extract_strided_slice %134 {offsets = [0, 0], sizes = [3, 16], strides = [1, 1]} : vector<3x320xf32> to vector<3x16xf32>
    %c0_126 = arith.constant 0 : index
    %c0_127 = arith.constant 0 : index
    %c0_128 = arith.constant 0 : index
    %136 = vector.load %arg10[%c0_126, %c0_127, %c0_128] : memref<1x3x256xf32, #tpu.memory_space<vmem>>, vector<1x3x16xf32>
    %137 = vector.shape_cast %136 : vector<1x3x16xf32> to vector<3x16xf32>
    %138 = vector.shape_cast %135 : vector<3x16xf32> to vector<1x3x16xf32>
    tpu.vector_store %arg10[%c0_126, %c0_127, %c0_128], %138 {strides = array<i32>} : memref<1x3x256xf32, #tpu.memory_space<vmem>>, vector<1x3x16xf32>,
    %139 = vector.extract_strided_slice %134 {offsets = [0, 20], sizes = [3, 16], strides = [1, 1]} : vector<3x320xf32> to vector<3x16xf32>
    %c0_129 = arith.constant 0 : index
    %c0_130 = arith.constant 0 : index
    %c16_131 = arith.constant 16 : index
    %140 = vector.load %arg10[%c0_129, %c0_130, %c16_131] : memref<1x3x256xf32, #tpu.memory_space<vmem>>, vector<1x3x16xf32>
    %141 = vector.shape_cast %140 : vector<1x3x16xf32> to vector<3x16xf32>
    %142 = vector.shape_cast %139 : vector<3x16xf32> to vector<1x3x16xf32>
    tpu.vector_store %arg10[%c0_129, %c0_130, %c16_131], %142 {strides = array<i32>} : memref<1x3x256xf32, #tpu.memory_space<vmem>>, vector<1x3x16xf32>,
    %143 = vector.extract_strided_slice %134 {offsets = [0, 40], sizes = [3, 16], strides = [1, 1]} : vector<3x320xf32> to vector<3x16xf32>
    %c0_132 = arith.constant 0 : index
    %c0_133 = arith.constant 0 : index
    %c32_134 = arith.constant 32 : index
    %144 = vector.load %arg10[%c0_132, %c0_133, %c32_134] : memref<1x3x256xf32, #tpu.memory_space<vmem>>, vector<1x3x16xf32>
    %145 = vector.shape_cast %144 : vector<1x3x16xf32> to vector<3x16xf32>
    %146 = vector.shape_cast %143 : vector<3x16xf32> to vector<1x3x16xf32>
    tpu.vector_store %arg10[%c0_132, %c0_133, %c32_134], %146 {strides = array<i32>} : memref<1x3x256xf32, #tpu.memory_space<vmem>>, vector<1x3x16xf32>,
    %147 = vector.extract_strided_slice %134 {offsets = [0, 60], sizes = [3, 16], strides = [1, 1]} : vector<3x320xf32> to vector<3x16xf32>
    %c0_135 = arith.constant 0 : index
    %c0_136 = arith.constant 0 : index
    %c48 = arith.constant 48 : index
    %148 = vector.load %arg10[%c0_135, %c0_136, %c48] : memref<1x3x256xf32, #tpu.memory_space<vmem>>, vector<1x3x16xf32>
    %149 = vector.shape_cast %148 : vector<1x3x16xf32> to vector<3x16xf32>
    %150 = vector.shape_cast %147 : vector<3x16xf32> to vector<1x3x16xf32>
    tpu.vector_store %arg10[%c0_135, %c0_136, %c48], %150 {strides = array<i32>} : memref<1x3x256xf32, #tpu.memory_space<vmem>>, vector<1x3x16xf32>,
    %151 = vector.extract_strided_slice %134 {offsets = [0, 80], sizes = [3, 16], strides = [1, 1]} : vector<3x320xf32> to vector<3x16xf32>
    %c0_137 = arith.constant 0 : index
    %c0_138 = arith.constant 0 : index
    %c64 = arith.constant 64 : index
    %152 = vector.load %arg10[%c0_137, %c0_138, %c64] : memref<1x3x256xf32, #tpu.memory_space<vmem>>, vector<1x3x16xf32>
    %153 = vector.shape_cast %152 : vector<1x3x16xf32> to vector<3x16xf32>
    %154 = vector.shape_cast %151 : vector<3x16xf32> to vector<1x3x16xf32>
    tpu.vector_store %arg10[%c0_137, %c0_138, %c64], %154 {strides = array<i32>} : memref<1x3x256xf32, #tpu.memory_space<vmem>>, vector<1x3x16xf32>,
    %155 = vector.extract_strided_slice %134 {offsets = [0, 100], sizes = [3, 16], strides = [1, 1]} : vector<3x320xf32> to vector<3x16xf32>
    %c0_139 = arith.constant 0 : index
    %c0_140 = arith.constant 0 : index
    %c80_141 = arith.constant 80 : index
    %156 = vector.load %arg10[%c0_139, %c0_140, %c80_141] : memref<1x3x256xf32, #tpu.memory_space<vmem>>, vector<1x3x16xf32>
    %157 = vector.shape_cast %156 : vector<1x3x16xf32> to vector<3x16xf32>
    %158 = vector.shape_cast %155 : vector<3x16xf32> to vector<1x3x16xf32>
    tpu.vector_store %arg10[%c0_139, %c0_140, %c80_141], %158 {strides = array<i32>} : memref<1x3x256xf32, #tpu.memory_space<vmem>>, vector<1x3x16xf32>,
    %159 = vector.extract_strided_slice %134 {offsets = [0, 120], sizes = [3, 16], strides = [1, 1]} : vector<3x320xf32> to vector<3x16xf32>
    %c0_142 = arith.constant 0 : index
    %c0_143 = arith.constant 0 : index
    %c96 = arith.constant 96 : index
    %160 = vector.load %arg10[%c0_142, %c0_143, %c96] : memref<1x3x256xf32, #tpu.memory_space<vmem>>, vector<1x3x16xf32>
    %161 = vector.shape_cast %160 : vector<1x3x16xf32> to vector<3x16xf32>
    %162 = vector.shape_cast %159 : vector<3x16xf32> to vector<1x3x16xf32>
    tpu.vector_store %arg10[%c0_142, %c0_143, %c96], %162 {strides = array<i32>} : memref<1x3x256xf32, #tpu.memory_space<vmem>>, vector<1x3x16xf32>,
    %163 = vector.extract_strided_slice %134 {offsets = [0, 140], sizes = [3, 16], strides = [1, 1]} : vector<3x320xf32> to vector<3x16xf32>
    %c0_144 = arith.constant 0 : index
    %c0_145 = arith.constant 0 : index
    %c112 = arith.constant 112 : index
    %164 = vector.load %arg10[%c0_144, %c0_145, %c112] : memref<1x3x256xf32, #tpu.memory_space<vmem>>, vector<1x3x16xf32>
    %165 = vector.shape_cast %164 : vector<1x3x16xf32> to vector<3x16xf32>
    %166 = vector.shape_cast %163 : vector<3x16xf32> to vector<1x3x16xf32>
    tpu.vector_store %arg10[%c0_144, %c0_145, %c112], %166 {strides = array<i32>} : memref<1x3x256xf32, #tpu.memory_space<vmem>>, vector<1x3x16xf32>,
    %167 = vector.extract_strided_slice %134 {offsets = [0, 160], sizes = [3, 16], strides = [1, 1]} : vector<3x320xf32> to vector<3x16xf32>
    %c0_146 = arith.constant 0 : index
    %c0_147 = arith.constant 0 : index
    %c128 = arith.constant 128 : index
    %168 = vector.load %arg10[%c0_146, %c0_147, %c128] : memref<1x3x256xf32, #tpu.memory_space<vmem>>, vector<1x3x16xf32>
    %169 = vector.shape_cast %168 : vector<1x3x16xf32> to vector<3x16xf32>
    %170 = vector.shape_cast %167 : vector<3x16xf32> to vector<1x3x16xf32>
    tpu.vector_store %arg10[%c0_146, %c0_147, %c128], %170 {strides = array<i32>} : memref<1x3x256xf32, #tpu.memory_space<vmem>>, vector<1x3x16xf32>,
    %171 = vector.extract_strided_slice %134 {offsets = [0, 180], sizes = [3, 16], strides = [1, 1]} : vector<3x320xf32> to vector<3x16xf32>
    %c0_148 = arith.constant 0 : index
    %c0_149 = arith.constant 0 : index
    %c144 = arith.constant 144 : index
    %172 = vector.load %arg10[%c0_148, %c0_149, %c144] : memref<1x3x256xf32, #tpu.memory_space<vmem>>, vector<1x3x16xf32>
    %173 = vector.shape_cast %172 : vector<1x3x16xf32> to vector<3x16xf32>
    %174 = vector.shape_cast %171 : vector<3x16xf32> to vector<1x3x16xf32>
    tpu.vector_store %arg10[%c0_148, %c0_149, %c144], %174 {strides = array<i32>} : memref<1x3x256xf32, #tpu.memory_space<vmem>>, vector<1x3x16xf32>,
    %175 = vector.extract_strided_slice %134 {offsets = [0, 200], sizes = [3, 16], strides = [1, 1]} : vector<3x320xf32> to vector<3x16xf32>
    %c0_150 = arith.constant 0 : index
    %c0_151 = arith.constant 0 : index
    %c160 = arith.constant 160 : index
    %176 = vector.load %arg10[%c0_150, %c0_151, %c160] : memref<1x3x256xf32, #tpu.memory_space<vmem>>, vector<1x3x16xf32>
    %177 = vector.shape_cast %176 : vector<1x3x16xf32> to vector<3x16xf32>
    %178 = vector.shape_cast %175 : vector<3x16xf32> to vector<1x3x16xf32>
    tpu.vector_store %arg10[%c0_150, %c0_151, %c160], %178 {strides = array<i32>} : memref<1x3x256xf32, #tpu.memory_space<vmem>>, vector<1x3x16xf32>,
    %179 = vector.extract_strided_slice %134 {offsets = [0, 220], sizes = [3, 16], strides = [1, 1]} : vector<3x320xf32> to vector<3x16xf32>
    %c0_152 = arith.constant 0 : index
    %c0_153 = arith.constant 0 : index
    %c176 = arith.constant 176 : index
    %180 = vector.load %arg10[%c0_152, %c0_153, %c176] : memref<1x3x256xf32, #tpu.memory_space<vmem>>, vector<1x3x16xf32>
    %181 = vector.shape_cast %180 : vector<1x3x16xf32> to vector<3x16xf32>
    %182 = vector.shape_cast %179 : vector<3x16xf32> to vector<1x3x16xf32>
    tpu.vector_store %arg10[%c0_152, %c0_153, %c176], %182 {strides = array<i32>} : memref<1x3x256xf32, #tpu.memory_space<vmem>>, vector<1x3x16xf32>,
    %183 = vector.extract_strided_slice %134 {offsets = [0, 240], sizes = [3, 16], strides = [1, 1]} : vector<3x320xf32> to vector<3x16xf32>
    %c0_154 = arith.constant 0 : index
    %c0_155 = arith.constant 0 : index
    %c192 = arith.constant 192 : index
    %184 = vector.load %arg10[%c0_154, %c0_155, %c192] : memref<1x3x256xf32, #tpu.memory_space<vmem>>, vector<1x3x16xf32>
    %185 = vector.shape_cast %184 : vector<1x3x16xf32> to vector<3x16xf32>
    %186 = vector.shape_cast %183 : vector<3x16xf32> to vector<1x3x16xf32>
    tpu.vector_store %arg10[%c0_154, %c0_155, %c192], %186 {strides = array<i32>} : memref<1x3x256xf32, #tpu.memory_space<vmem>>, vector<1x3x16xf32>,
    %187 = vector.extract_strided_slice %134 {offsets = [0, 260], sizes = [3, 16], strides = [1, 1]} : vector<3x320xf32> to vector<3x16xf32>
    %c0_156 = arith.constant 0 : index
    %c0_157 = arith.constant 0 : index
    %c208 = arith.constant 208 : index
    %188 = vector.load %arg10[%c0_156, %c0_157, %c208] : memref<1x3x256xf32, #tpu.memory_space<vmem>>, vector<1x3x16xf32>
    %189 = vector.shape_cast %188 : vector<1x3x16xf32> to vector<3x16xf32>
    %190 = vector.shape_cast %187 : vector<3x16xf32> to vector<1x3x16xf32>
    tpu.vector_store %arg10[%c0_156, %c0_157, %c208], %190 {strides = array<i32>} : memref<1x3x256xf32, #tpu.memory_space<vmem>>, vector<1x3x16xf32>,
    %191 = vector.extract_strided_slice %134 {offsets = [0, 280], sizes = [3, 16], strides = [1, 1]} : vector<3x320xf32> to vector<3x16xf32>
    %c0_158 = arith.constant 0 : index
    %c0_159 = arith.constant 0 : index
    %c224 = arith.constant 224 : index
    %192 = vector.load %arg10[%c0_158, %c0_159, %c224] : memref<1x3x256xf32, #tpu.memory_space<vmem>>, vector<1x3x16xf32>
    %193 = vector.shape_cast %192 : vector<1x3x16xf32> to vector<3x16xf32>
    %194 = vector.shape_cast %191 : vector<3x16xf32> to vector<1x3x16xf32>
    tpu.vector_store %arg10[%c0_158, %c0_159, %c224], %194 {strides = array<i32>} : memref<1x3x256xf32, #tpu.memory_space<vmem>>, vector<1x3x16xf32>,
    %195 = vector.extract_strided_slice %134 {offsets = [0, 300], sizes = [3, 16], strides = [1, 1]} : vector<3x320xf32> to vector<3x16xf32>
    %c0_160 = arith.constant 0 : index
    %c0_161 = arith.constant 0 : index
    %c240 = arith.constant 240 : index
    %196 = vector.load %arg10[%c0_160, %c0_161, %c240] : memref<1x3x256xf32, #tpu.memory_space<vmem>>, vector<1x3x16xf32>
    %197 = vector.shape_cast %196 : vector<1x3x16xf32> to vector<3x16xf32>
    %198 = vector.shape_cast %195 : vector<3x16xf32> to vector<1x3x16xf32>
    tpu.vector_store %arg10[%c0_160, %c0_161, %c240], %198 {strides = array<i32>} : memref<1x3x256xf32, #tpu.memory_space<vmem>>, vector<1x3x16xf32>,
    return
  }
  func.func @transform_0(%arg0: i32) -> (i32, i32, i32) {
    %c0_i32 = arith.constant 0 : i32
    %c0_i32_0 = arith.constant 0 : i32
    %c0_i32_1 = arith.constant 0 : i32
    return %arg0, %c0_i32, %c0_i32_0 : i32, i32, i32
  }
  func.func @transform_1(%arg0: i32) -> (i32, i32) {
    %c0_i32 = arith.constant 0 : i32
    %c0_i32_0 = arith.constant 0 : i32
    %c0_i32_1 = arith.constant 0 : i32
    return %c0_i32, %c0_i32_0 : i32, i32
  }
  func.func @transform_2(%arg0: i32) -> (i32, i32) {
    %c0_i32 = arith.constant 0 : i32
    %c0_i32_0 = arith.constant 0 : i32
    %c0_i32_1 = arith.constant 0 : i32
    return %c0_i32, %c0_i32_0 : i32, i32
  }
  func.func @transform_3(%arg0: i32) -> (i32, i32, i32) {
    %c0_i32 = arith.constant 0 : i32
    %c0_i32_0 = arith.constant 0 : i32
    %c0_i32_1 = arith.constant 0 : i32
    %c0_i32_2 = arith.constant 0 : i32
    return %c0_i32, %c0_i32_0, %c0_i32_1 : i32, i32, i32
  }
  func.func @transform_4(%arg0: i32) -> (i32, i32) {
    %c0_i32 = arith.constant 0 : i32
    %c0_i32_0 = arith.constant 0 : i32
    %c0_i32_1 = arith.constant 0 : i32
    return %c0_i32, %c0_i32_0 : i32, i32
  }
  func.func @transform_5(%arg0: i32) -> (i32, i32) {
    %c0_i32 = arith.constant 0 : i32
    %c0_i32_0 = arith.constant 0 : i32
    %c0_i32_1 = arith.constant 0 : i32
    return %c0_i32, %c0_i32_0 : i32, i32
  }
  func.func @transform_6(%arg0: i32) -> (i32, i32) {
    %c0_i32 = arith.constant 0 : i32
    %c0_i32_0 = arith.constant 0 : i32
    %c0_i32_1 = arith.constant 0 : i32
    return %c0_i32, %c0_i32_0 : i32, i32
  }
  func.func @transform_7(%arg0: i32) -> (i32, i32, i32) {
    %c0_i32 = arith.constant 0 : i32
    %c0_i32_0 = arith.constant 0 : i32
    %c0_i32_1 = arith.constant 0 : i32
    %c0_i32_2 = arith.constant 0 : i32
    return %c0_i32, %c0_i32_0, %c0_i32_1 : i32, i32, i32
  }
  func.func @transform_8(%arg0: i32) -> (i32, i32) {
    %c0_i32 = arith.constant 0 : i32
    %c0_i32_0 = arith.constant 0 : i32
    %c0_i32_1 = arith.constant 0 : i32
    return %c0_i32, %c0_i32_0 : i32, i32
  }
  func.func @transform_9(%arg0: i32) -> (i32, i32, i32) {
    %c0_i32 = arith.constant 0 : i32
    %c0_i32_0 = arith.constant 0 : i32
    %c0_i32_1 = arith.constant 0 : i32
    return %arg0, %c0_i32, %c0_i32_0 : i32, i32, i32
  }
}

</mosaic_0001>

<bundles_post_ra>
// kernel: deblur_pallas.1
= control target key start
LH: loop header
LB: loop body
LE: loop exit
PB: predicated region body
PF: predicated region fallthrough
CT: control target
= control target key end

     0   :  { %s2703_s30 = smov 0   ;;  %s3285_s0 = inlined_call_operand.vmem [shape: f32[2,72,256], index: 0, kind: input, shape index: {}]   ;;  %s3286_s1 = inlined_call_operand.vmem [shape: f32[1,240], index: 1, kind: input, shape index: {}]   ;;  %s3287_s2 = inlined_call_operand.vmem [shape: f32[1,320], index: 2, kind: input, shape index: {}]   ;;  %s3288_s3 = inlined_call_operand.vmem [shape: f32[9,8,72], index: 3, kind: input, shape index: {}]   ;;  %s3289_s4 = inlined_call_operand.vmem [shape: f32[8,1], index: 4, kind: input, shape index: {}]   ;;  %s3290_s5 = inlined_call_operand.vmem [shape: f32[4,8], index: 5, kind: input, shape index: {}]   ;;  %s3291_s6 = inlined_call_operand.vmem [shape: f32[4,1], index: 6, kind: input, shape index: {}]   ;;  %s3292_s7 = inlined_call_operand.vmem [shape: f32[5,3,40], index: 7, kind: input, shape index: {}]   ;;  %s3293_s8 = inlined_call_operand.vmem [shape: f32[3,1], index: 8, kind: input, shape index: {}]   ;;  %s3294_s9 = inlined_call_operand.vmem [shape: f32[2,3,256], index: 9, kind: output, shape index: {}]  }
   0x1 LB: > { %s2436_s10 = sadd.s32 4294967295, %s2625_s30   ;;  %p2440_p0 = scmp.ge.s32.totalorder %s2625_s30, 1  ;;  %s2625_s30 = sphi %s2703_s30, %s19_s30  }
   0x2   : > { %p287_p1 = scmp.lt.s32.totalorder %s2625_s30, 3 }
   0x4   : > { %p288_p2 = pnand %p2440_p0, %p287_p1 }
   0x5   : > { %p323_p3 = scmp.lt.s32.totalorder (!%p288_p2), %s2436_s10, 1  ;;  %s2630_s15 = smov (!%p288_p2), 126  }
   0x6   : > { %291 = sbr.rel (%p288_p2) target bundleno = 1524 (0x5f4), region = 56  ;;  %s2631_s16 = smov (!%p288_p2), 125  }
   0x7   : > { %s2632_s17 = smov (!%p288_p2), 124   ;;  %s2633_s18 = smov (!%p288_p2), 123  }
   0x8   : > { %s2634_s19 = smov (!%p288_p2), 122   ;;  %s2635_s20 = smov (!%p288_p2), 121  }
   0x9   : > { %s2636_s23 = smov (!%p288_p2), 120   ;;  %s2637_s26 = smov (!%p288_p2), 42  }
   0xa   : > { %s2642_s21 = smov (!%p288_p2), 108   ;;  %s2645_s24 = smov (!%p288_p2), 96  }
   0xb   : > { %v2627_v0 = vmov 0.0   ;;  %s3296_s10 = smov (!%p323_p3, %s2436_s10), 1  ;;  %v333_v19 = vld [vmem:[%s3288_s3] sm:$0xff]  ;;  %vm352_vm0 = vcmask 588800   ;;  %v2445_v20 = vld [vmem:[%s3288_s3 + $0x8] sm:$0xff]  ;;  %v2447_v21 = vld [vmem:[%s3288_s3 + $0x10] sm:$0xff] }
   0xc   : > { %420 = vmatprep.mubr.f32.mxu0 %v2627_v0  ;;  %1157 = vst [vmem:[#allocation2] sm:$0xff] %v2627_v0  ;;  %1355 = vst [vmem:[#allocation3] sm:$0xff] %v2627_v0  ;;  %498 = vmatprep.mubr.f32.mxu1 %v2627_v0  ;;  %s2582_s11 = smul.u32 144, %s3296_s10  ;;  %v2449_v22 = vld [vmem:[%s3288_s3 + $0x18] sm:$0xff]  ;;  %v2451_v23 = vld [vmem:[%s3288_s3 + $0x20] sm:$0xff]  ;;  %v2628_v28 = vmov 0  }
   0xd   : > { %1356 = vst [vmem:[#allocation3 + $0x8] sm:$0xff] %v2627_v0  ;;  %1357 = vst [vmem:[#allocation3 + $0x10] sm:$0xff] %v2627_v0  ;;  %v2453_v24 = vld [vmem:[%s3288_s3 + $0x28] sm:$0xff]  ;;  %v2455_v25 = vld [vmem:[%s3288_s3 + $0x30] sm:$0xff]  ;;  %2617 = vset.pattern.permute.xlu0 %v2628_v28  ;;  %2618 = vset.pattern.permute.xlu1 %v2628_v28  ;;  %vm1159_vm1 = vcmask 523264   ;;  %vm511_vm2 = vcmask 1039360  }
   0xe   : > { %s2723_s14 = scalar_lea.vmem %s3285_s0, %s2582_s11  ;;  %v2457_v26 = vld [vmem:[%s3288_s3 + $0x38] sm:$0xff]  ;;  %v2459_v27 = vld [vmem:[%s3288_s3 + $0x40] sm:$0xff]  ;;  %1160 = vst.msk [vmem:[#allocation2 + $0x10] sm:$0xff] %vm1159_vm1, %v2627_v0  ;;  %vm599_vm3 = vcmask 1031168   ;;  %vm687_vm4 = vcmask 1022976   ;;  %vm775_vm5 = vcmask 1014784  }
   0xf   : > { %v2726_v1 = vld [vmem:[%s2723_s14 + $0x88] sm:$0xff]  ;;  %v2729_v2 = vld [vmem:[%s2723_s14 + $0x80] sm:$0xff]  ;;  %v2732_v3 = vld [vmem:[%s2723_s14 + $0x78] sm:$0xff]  ;;  %vm863_vm6 = vcmask 1006592   ;;  %vm951_vm7 = vcmask 998400   ;;  %vm1039_vm8 = vcmask 990208  }
  0x10   : > { %370 = vmatprep.subr.mxu0 %v2726_v1  ;;  %448 = vmatprep.subr.mxu1 %v2726_v1  ;;  %v2737_v4 = vld [vmem:[%s2723_s14 + $0x70] sm:$0xff]  ;;  %v2742_v5 = vld [vmem:[%s2723_s14 + $0x68] sm:$0xff]  ;;  %v2747_v6 = vld [vmem:[%s2723_s14 + $0x60] sm:$0xff]  ;;  %vm1127_vm9 = vcmask 982016   ;;  %vm2638_vm10 = vmmov 0   ;;  %vm1175_vm11 = vcmask 211968  }
  0x11   : > { %371 = vmatpush1.msra.mxu0 %v2729_v2  ;;  %449 = vmatpush1.msra.mxu1 %v2729_v2  ;;  %v2752_v7 = vld [vmem:[%s2723_s14 + $0x58] sm:$0xff]  ;;  %v2757_v8 = vld [vmem:[%s2723_s14 + $0x50] sm:$0xff]  ;;  %v2762_v9 = vld [vmem:[%s2723_s14 + $0x48] sm:$0xff]  ;;  %vm1167_vm12 = vcmask 343040   ;;  %vm1172_vm13 = vcmask 1047888   ;;  %vm1187_vm14 = vcmask 64512  }
  0x12   : > { %372 = vmatprep.subr.mxu0 %v2732_v3  ;;  %450 = vmatprep.subr.mxu1 %v2732_v3  ;;  %v2767_v10 = vld [vmem:[%s2723_s14 + $0x40] sm:$0xff]  ;;  %v2772_v11 = vld [vmem:[%s2723_s14 + $0x38] sm:$0xff]  ;;  %v2777_v12 = vld [vmem:[%s2723_s14 + $0x30] sm:$0xff]  ;;  %vm1358_vm15 = vcmask 130048   ;;  %s2646_s28 = smov 92   ;;  %s2648_s29 = smov 116  }
  0x13   : > { %373 = vmatpush1.msra.mxu0 %v2737_v4  ;;  %451 = vmatpush1.msra.mxu1 %v2737_v4  ;;  %v2782_v13 = vld [vmem:[%s2723_s14 + $0x28] sm:$0xff]  ;;  %v2787_v14 = vld [vmem:[%s2723_s14 + $0x20] sm:$0xff]  ;;  %v2792_v15 = vld [vmem:[%s2723_s14 + $0x18] sm:$0xff]  ;;  %1359 = vst.msk [vmem:[#allocation3 + $0x18] sm:$0xff] %vm1358_vm15, %v2627_v0  ;;  %s2649_s11 = smov 84   ;;  %s2650_s12 = smov 80  }
  0x14   : > { %374 = vmatprep.subr.mxu0 %v2742_v5  ;;  %452 = vmatprep.subr.mxu1 %v2742_v5  ;;  %v2797_v16 = vld [vmem:[%s2723_s14 + $0x10] sm:$0xff]  ;;  %v2802_v17 = vld [vmem:[%s2723_s14 + $0x8] sm:$0xff]  ;;  %v2807_v18 = vld [vmem:[%s2723_s14] sm:$0xff]  ;;  %s2629_s14 = smov 127   ;;  %vm2341_vm15 = vcmask 912128  }
  0x15   : > { %375 = vmatpush1.msra.mxu0 %v2747_v6  ;;  %453 = vmatpush1.msra.mxu1 %v2747_v6  ;;  %v1133_v45 = vld [vmem:[%s3289_s4] sm:$0xff] }
  0x16   : > { %376 = vmatprep.subr.mxu0 %v2752_v7  ;;  %454 = vmatprep.subr.mxu1 %v2752_v7 }
  0x17   : > { %377 = vmatpush1.msra.mxu0 %v2757_v8  ;;  %455 = vmatpush1.msra.mxu1 %v2757_v8 }
  0x18   : > { %378 = vmatprep.subr.mxu0 %v2762_v9  ;;  %456 = vmatprep.subr.mxu1 %v2762_v9 }
  0x19   : > { %379 = vmatpush1.msra.mxu0 %v2767_v10  ;;  %457 = vmatpush1.msra.mxu1 %v2767_v10 }
  0x1a   : > { %380 = vmatprep.subr.mxu0 %v2772_v11  ;;  %458 = vmatprep.subr.mxu1 %v2772_v11 }
  0x1b   : > { %381 = vmatpush1.msra.mxu0 %v2777_v12  ;;  %459 = vmatpush1.msra.mxu1 %v2777_v12 }
  0x1c   : > { %382 = vmatprep.subr.mxu0 %v2782_v13  ;;  %460 = vmatprep.subr.mxu1 %v2782_v13 }
  0x1d   : > { %383 = vmatpush1.msra.mxu0 %v2787_v14  ;;  %461 = vmatpush1.msra.mxu1 %v2787_v14 }
  0x1e   : > { %384 = vmatprep.subr.mxu0 %v2792_v15  ;;  %462 = vmatprep.subr.mxu1 %v2792_v15 }
  0x1f   : > { %385 = vmatpush1.msra.mxu0 %v2797_v16  ;;  %463 = vmatpush1.msra.mxu1 %v2797_v16 }
  0x20   : > { %386 = vmatprep.subr.mxu0 %v2802_v17  ;;  %464 = vmatprep.subr.mxu1 %v2802_v17 }
  0x21   : > { %387 = vmatpush1.msra.mxu0 %v2807_v18  ;;  %465 = vmatpush1.msra.mxu1 %v2807_v18 }
  0x22   : > { %2444 = vmatmul.mubr.msk.f32.vlgmr.msra.gmra.mxu0 %vm352_vm0, %v333_v19  ;;  %2446 = vmatmul.mubr.msk.f32.vlgmr.msra.gmra.mxu1 %vm352_vm0, %v2445_v20 }
  0x23   : > { %536 = vmatprep.subr.mxu0 %v2726_v1  ;;  %624 = vmatprep.subr.mxu1 %v2726_v1 }
  0x24   : > { %537 = vmatpush1.msra.mxu0 %v2729_v2  ;;  %625 = vmatpush1.msra.mxu1 %v2729_v2 }
  0x25   : > { %538 = vmatprep.subr.mxu0 %v2732_v3  ;;  %626 = vmatprep.subr.mxu1 %v2732_v3 }
  0x26   : > { %539 = vmatpush1.msra.mxu0 %v2737_v4  ;;  %627 = vmatpush1.msra.mxu1 %v2737_v4 }
  0x27   : > { %540 = vmatprep.subr.mxu0 %v2742_v5  ;;  %628 = vmatprep.subr.mxu1 %v2742_v5 }
  0x28   : > { %541 = vmatpush1.msra.mxu0 %v2747_v6  ;;  %629 = vmatpush1.msra.mxu1 %v2747_v6 }
  0x29   : > { %542 = vmatprep.subr.mxu0 %v2752_v7  ;;  %630 = vmatprep.subr.mxu1 %v2752_v7 }
  0x2a   : > { %543 = vmatpush1.msra.mxu0 %v2757_v8  ;;  %631 = vmatpush1.msra.mxu1 %v2757_v8 }
  0x2b   : > { %544 = vmatprep.subr.mxu0 %v2762_v9  ;;  %632 = vmatprep.subr.mxu1 %v2762_v9 }
  0x2c   : > { %545 = vmatpush1.msra.mxu0 %v2767_v10  ;;  %633 = vmatpush1.msra.mxu1 %v2767_v10 }
  0x2d   : > { %546 = vmatprep.subr.mxu0 %v2772_v11  ;;  %634 = vmatprep.subr.mxu1 %v2772_v11 }
  0x2e   : > { %547 = vmatpush1.msra.mxu0 %v2777_v12  ;;  %635 = vmatpush1.msra.mxu1 %v2777_v12 }
  0x2f   : > { %548 = vmatprep.subr.mxu0 %v2782_v13  ;;  %636 = vmatprep.subr.mxu1 %v2782_v13 }
  0x30   : > { %549 = vmatpush1.msra.mxu0 %v2787_v14  ;;  %586 = vmatprep.mubr.f32.mxu0 %v2627_v0 }
  0x31   : > { %550 = vmatprep.subr.mxu0 %v2792_v15  ;;  %637 = vmatpush1.msra.mxu1 %v2787_v14 }
  0x32   : > { %551 = vmatpush1.msra.mxu0 %v2797_v16  ;;  %638 = vmatprep.subr.mxu1 %v2792_v15 }
  0x33   : > { %552 = vmatprep.subr.mxu0 %v2802_v17  ;;  %639 = vmatpush1.msra.mxu1 %v2797_v16 }
  0x34   : > { %553 = vmatpush1.msra.mxu0 %v2807_v18  ;;  %640 = vmatprep.subr.mxu1 %v2802_v17 }
  0x35   : > { %2448 = vmatmul.mubr.msk.f32.vlgmr.msra.gmra.mxu0 %vm352_vm0, %v2447_v21  ;;  %712 = vmatprep.subr.mxu0 %v2726_v1 }
  0x36   : > { %713 = vmatpush1.msra.mxu0 %v2729_v2  ;;  %641 = vmatpush1.msra.mxu1 %v2807_v18 }
  0x37   : > { %714 = vmatprep.subr.mxu0 %v2732_v3  ;;  %674 = vmatprep.mubr.f32.mxu1 %v2627_v0 }
  0x38   : > { %715 = vmatpush1.msra.mxu0 %v2737_v4  ;;  %800 = vmatprep.subr.mxu1 %v2726_v1 }
  0x39   : > { %716 = vmatprep.subr.mxu0 %v2742_v5  ;;  %2450 = vmatmul.mubr.msk.f32.vlgmr.msra.gmra.mxu1 %vm352_vm0, %v2449_v22 }
  0x3a   : > { %717 = vmatpush1.msra.mxu0 %v2747_v6  ;;  %801 = vmatpush1.msra.mxu1 %v2729_v2 }
  0x3b   : > { %718 = vmatprep.subr.mxu0 %v2752_v7  ;;  %802 = vmatprep.subr.mxu1 %v2732_v3 }
  0x3c   : > { %719 = vmatpush1.msra.mxu0 %v2757_v8  ;;  %803 = vmatpush1.msra.mxu1 %v2737_v4 }
  0x3d   : > { %720 = vmatprep.subr.mxu0 %v2762_v9  ;;  %804 = vmatprep.subr.mxu1 %v2742_v5 }
  0x3e   : > { %721 = vmatpush1.msra.mxu0 %v2767_v10  ;;  %805 = vmatpush1.msra.mxu1 %v2747_v6 }
  0x3f   : > { %722 = vmatprep.subr.mxu0 %v2772_v11  ;;  %806 = vmatprep.subr.mxu1 %v2752_v7 }
  0x40   : > { %723 = vmatpush1.msra.mxu0 %v2777_v12  ;;  %807 = vmatpush1.msra.mxu1 %v2757_v8 }
  0x41   : > { %724 = vmatprep.subr.mxu0 %v2782_v13  ;;  %808 = vmatprep.subr.mxu1 %v2762_v9 }
  0x42   : > { %725 = vmatpush1.msra.mxu0 %v2787_v14  ;;  %809 = vmatpush1.msra.mxu1 %v2767_v10 }
  0x43   : > { %726 = vmatprep.subr.mxu0 %v2792_v15  ;;  %810 = vmatprep.subr.mxu1 %v2772_v11 }
  0x44   : > { %727 = vmatpush1.msra.mxu0 %v2797_v16  ;;  %811 = vmatpush1.msra.mxu1 %v2777_v12 }
  0x45   : > { %728 = vmatprep.subr.mxu0 %v2802_v17  ;;  %812 = vmatprep.subr.mxu1 %v2782_v13 }
  0x46   : > { %729 = vmatpush1.msra.mxu0 %v2807_v18  ;;  %762 = vmatprep.mubr.f32.mxu0 %v2627_v0 }
  0x47   : > { %813 = vmatpush1.msra.mxu1 %v2787_v14  ;;  %2452 = vmatmul.mubr.msk.f32.vlgmr.msra.gmra.mxu0 %vm352_vm0, %v2451_v23 }
  0x48   : > { %814 = vmatprep.subr.mxu1 %v2792_v15  ;;  %888 = vmatprep.subr.mxu0 %v2726_v1 }
  0x49   : > { %815 = vmatpush1.msra.mxu1 %v2797_v16  ;;  %889 = vmatpush1.msra.mxu0 %v2729_v2 }
  0x4a   : > { %816 = vmatprep.subr.mxu1 %v2802_v17  ;;  %890 = vmatprep.subr.mxu0 %v2732_v3 }
  0x4b   : > { %817 = vmatpush1.msra.mxu1 %v2807_v18  ;;  %850 = vmatprep.mubr.f32.mxu1 %v2627_v0 }
  0x4c   : > { %891 = vmatpush1.msra.mxu0 %v2737_v4  ;;  %2454 = vmatmul.mubr.msk.f32.vlgmr.msra.gmra.mxu1 %vm352_vm0, %v2453_v24 }
  0x4d   : > { %892 = vmatprep.subr.mxu0 %v2742_v5  ;;  %976 = vmatprep.subr.mxu1 %v2726_v1 }
  0x4e   : > { %893 = vmatpush1.msra.mxu0 %v2747_v6  ;;  %977 = vmatpush1.msra.mxu1 %v2729_v2 }
  0x4f   : > { %894 = vmatprep.subr.mxu0 %v2752_v7  ;;  %978 = vmatprep.subr.mxu1 %v2732_v3 }
  0x50   : > { %895 = vmatpush1.msra.mxu0 %v2757_v8  ;;  %979 = vmatpush1.msra.mxu1 %v2737_v4 }
  0x51   : > { %896 = vmatprep.subr.mxu0 %v2762_v9  ;;  %980 = vmatprep.subr.mxu1 %v2742_v5 }
  0x52   : > { %897 = vmatpush1.msra.mxu0 %v2767_v10  ;;  %981 = vmatpush1.msra.mxu1 %v2747_v6 }
  0x53   : > { %898 = vmatprep.subr.mxu0 %v2772_v11  ;;  %982 = vmatprep.subr.mxu1 %v2752_v7 }
  0x54   : > { %899 = vmatpush1.msra.mxu0 %v2777_v12  ;;  %983 = vmatpush1.msra.mxu1 %v2757_v8 }
  0x55   : > { %900 = vmatprep.subr.mxu0 %v2782_v13  ;;  %984 = vmatprep.subr.mxu1 %v2762_v9 }
  0x56   : > { %901 = vmatpush1.msra.mxu0 %v2787_v14  ;;  %985 = vmatpush1.msra.mxu1 %v2767_v10 }
  0x57   : > { %902 = vmatprep.subr.mxu0 %v2792_v15  ;;  %986 = vmatprep.subr.mxu1 %v2772_v11 }
  0x58   : > { %903 = vmatpush1.msra.mxu0 %v2797_v16  ;;  %987 = vmatpush1.msra.mxu1 %v2777_v12 }
  0x59   : > { %904 = vmatprep.subr.mxu0 %v2802_v17  ;;  %988 = vmatprep.subr.mxu1 %v2782_v13 }
  0x5a   : > { %905 = vmatpush1.msra.mxu0 %v2807_v18  ;;  %938 = vmatprep.mubr.f32.mxu0 %v2627_v0 }
  0x5b   : > { %989 = vmatpush1.msra.mxu1 %v2787_v14  ;;  %2456 = vmatmul.mubr.msk.f32.vlgmr.msra.gmra.mxu0 %vm352_vm0, %v2455_v25 }
  0x5c   : > { %990 = vmatprep.subr.mxu1 %v2792_v15  ;;  %1064 = vmatprep.subr.mxu0 %v2726_v1 }
  0x5d   : > { %991 = vmatpush1.msra.mxu1 %v2797_v16  ;;  %1065 = vmatpush1.msra.mxu0 %v2729_v2 }
  0x5e   : > { %992 = vmatprep.subr.mxu1 %v2802_v17  ;;  %1066 = vmatprep.subr.mxu0 %v2732_v3 }
  0x5f   : > { %993 = vmatpush1.msra.mxu1 %v2807_v18  ;;  %1026 = vmatprep.mubr.f32.mxu1 %v2627_v0 }
  0x60   : > { %1067 = vmatpush1.msra.mxu0 %v2737_v4  ;;  %2458 = vmatmul.mubr.msk.f32.vlgmr.msra.gmra.mxu1 %vm352_vm0, %v2457_v26  ;;  %v1143_v26 = vld [vmem:[%s3286_s1] sm:$0x3] }
  0x61   : > { %1068 = vmatprep.subr.mxu0 %v2742_v5  ;;  %1114 = vmatprep.mubr.f32.mxu0 %v2627_v0 }
  0x62   : > { %1069 = vmatpush1.msra.mxu0 %v2747_v6  ;;  %1255 = vmatprep.mubr.f32.mxu1 %v2627_v0  ;;  %v1145_v6 = vlaneseq }
  0x63   : > { %1070 = vmatprep.subr.mxu0 %v2752_v7 }
  0x64   : > { %1071 = vmatpush1.msra.mxu0 %v2757_v8 }
  0x65   : > { %1072 = vmatprep.subr.mxu0 %v2762_v9 }
  0x66   : > { %1073 = vmatpush1.msra.mxu0 %v2767_v10 }
  0x67   : > { %1074 = vmatprep.subr.mxu0 %v2772_v11 }
  0x68   : > { %1075 = vmatpush1.msra.mxu0 %v2777_v12 }
  0x69   : > { %1076 = vmatprep.subr.mxu0 %v2782_v13 }
  0x6a   : > { %1077 = vmatpush1.msra.mxu0 %v2787_v14 }
  0x6b   : > { %1078 = vmatprep.subr.mxu0 %v2792_v15  ;;  %v3005_v15 = vshrl.u32 %v1145_v6, 7 }
  0x6c   : > { %1079 = vmatpush1.msra.mxu0 %v2797_v16 }
  0x6d   : > { %1080 = vmatprep.subr.mxu0 %v2802_v17  ;;  %v1151_v22 = vsub.s32 1, %v3005_v15 }
  0x6e   : > { %1081 = vmatpush1.msra.mxu0 %v2807_v18 }
  0x6f   : > { %2460 = vmatmul.mubr.msk.f32.vlgmr.msra.gmra.mxu0 %vm352_vm0, %v2459_v27  ;;  %2517 = vmatprep.subr.mxu0 %v2627_v0  ;;  %v1147_v27 = vsub.s32 0, %v3005_v15  ;;  %vm1379_vm0 = vcmask 1048064  }
  0x70   : > { %2527 = vmatprep.mubr.msk.f32.mxu0 %vm2638_vm10, %v2627_v0  ;;  %1380 = vst.msk [vmem:[#allocation4 + $0x10] sm:$0xff] %vm1379_vm0, %v2627_v0  ;;  %1383 = vst.msk [vmem:[#allocation4 + $0x58] sm:$0xff] %vm1379_vm0, %v2627_v0 }
  0x71   : > { %1381 = vst.msk [vmem:[#allocation4 + $0x28] sm:$0xff] %vm1379_vm0, %v2627_v0  ;;  %1382 = vst.msk [vmem:[#allocation4 + $0x40] sm:$0xff] %vm1379_vm0, %v2627_v0 }
  0x72   : > { %1384 = vst.msk [vmem:[#allocation4 + $0x70] sm:$0xff] %vm1379_vm0, %v2627_v0  ;;  %vm2346_vm0 = vcmask 1043328  }
  0xe2   : > { %v500_v29 = vpop.f32.mrf.mxu1  ;;  %v422_v31 = vpop.f32.mrf.mxu0 }
  0xe3   : > { %507 = vrot.lane.b32.xlu0 %v500_v29, %s2629_s14 }
  0xe4   : > { %v502_v30 = vpop.f32.mrf.mxu1  ;;  %v424_v32 = vpop.f32.mrf.mxu0 }
  0xe7   : > { %509 = vrot.lane.b32.xlu0 %v502_v30, %s2629_s14 }
  0xf5   : > { %v588_v33 = vpop.f32.mrf.mxu0 }
  0xf6   : > { %595 = vrot.lane.b32.xlu1 %v588_v33, %s2630_s15 }
  0xf7   : > { %v590_v34 = vpop.f32.mrf.mxu0 }
  0xf9   : > { %v676_v35 = vpop.f32.mrf.mxu1 }
  0xfa   : > { %597 = vrot.lane.b32.xlu1 %v590_v34, %s2630_s15  ;;  %683 = vrot.lane.b32.xlu0 %v676_v35, %s2631_s16  ;;  %v1148_v34 = vrot.slane %v1143_v26, %v1147_v27 }
  0xfb   : > { %v678_v36 = vpop.f32.mrf.mxu1 }
  0xfe   : > { %685 = vrot.lane.b32.xlu1 %v678_v36, %s2631_s16 }
 0x107   : > { %v764_v37 = vpop.f32.mrf.mxu0 }
 0x108   : > { %771 = vrot.lane.b32.xlu0 %v764_v37, %s2632_s17 }
 0x109   : > { %v766_v38 = vpop.f32.mrf.mxu0 }
 0x10a   : > { %773 = vrot.lane.b32.xlu1 %v766_v38, %s2632_s17 }
 0x10c   : > { %v852_v39 = vpop.f32.mrf.mxu1 }
 0x10d   : > { %859 = vrot.lane.b32.xlu0 %v852_v39, %s2633_s18  ;;  %v1181_v39 = vld [vmem:[%s3291_s6] sm:$0xf] }
 0x10e   : > { %v854_v40 = vpop.f32.mrf.mxu1 }
 0x10f   : > { %861 = vrot.lane.b32.xlu1 %v854_v40, %s2633_s18  ;;  %s2639_s18 = smov 48  }
 0x11b   : > { %v940_v41 = vpop.f32.mrf.mxu0 }
 0x11c   : > { %947 = vrot.lane.b32.xlu0 %v940_v41, %s2634_s19 }
 0x11d   : > { %v942_v42 = vpop.f32.mrf.mxu0 }
 0x11e   : > { %949 = vrot.lane.b32.xlu1 %v942_v42, %s2634_s19  ;;  %s2640_s19 = smov 68  }
 0x120   : > { %v1028_v43 = vpop.f32.mrf.mxu1 }
 0x121   : > { %1035 = vrot.lane.b32.xlu0 %v1028_v43, %s2635_s20  ;;  %v1177_v43 = vld [vmem:[%s3290_s5] sm:$0xf] }
 0x122   : > { %v1030_v44 = vpop.f32.mrf.mxu1 }
 0x123   : > { %1037 = vrot.lane.b32.xlu1 %v1030_v44, %s2635_s20  ;;  %s2641_s20 = smov 88  }
 0x125   : > { %1136 = vperm.xlu0 %2617, %v1133_v45  }
 0x12f   : > { %v1116_v46 = vpop.f32.mrf.mxu0 }
 0x130   : > { %1123 = vrot.lane.b32.xlu1 %v1116_v46, %s2636_s23  ;;  %v1335_v46 = vld [vmem:[%s3287_s2] sm:$0x7] }
 0x131   : > { %v1118_v47 = vpop.f32.mrf.mxu0 }
 0x134   : > { %1125 = vrot.lane.b32.xlu1 %v1118_v47, %s2636_s23 }
 0x155   : > { %v508_v49 = vpop.permute.xlu0 %507 }
 0x159   : > { %v510_v51 = vpop.permute.xlu0 %509 }
 0x15a   : > { %v512_v58 = vsel %vm511_vm2, %v508_v49, %v510_v51  ;;  %v516_v60 = vadd.f32 %v510_v51, %v424_v32  ;;  %v1152_v32 = vrot.slane %v1143_v26, %v1151_v22  ;;  %v1347_v49 = vsub.s32 2, %v3005_v15 }
 0x15b   : > { %v515_v62 = vadd.f32 %v512_v58, %v422_v31  ;;  %v1340_v51 = vrot.slane %v1335_v46, %v1147_v27 }
 0x168   : > { %v596_v48 = vpop.permute.xlu1 %595 }
 0x16c   : > { %v598_v50 = vpop.permute.xlu1 %597  ;;  %v684_v53 = vpop.permute.xlu0 %683 }
 0x16d   : > { %v600_v61 = vsel %vm599_vm3, %v596_v48, %v598_v50  ;;  %v604_v1 = vadd.f32 %v598_v50, %v516_v60 }
 0x16e   : > { %v603_v3 = vadd.f32 %v600_v61, %v515_v62 }
 0x170   : > { %v686_v52 = vpop.permute.xlu1 %685 }
 0x171   : > { %v688_v2 = vsel %vm687_vm4, %v684_v53, %v686_v52  ;;  %v692_v4 = vadd.f32 %v686_v52, %v604_v1 }
 0x172   : > { %v691_v7 = vadd.f32 %v688_v2, %v603_v3  ;;  %v1457_v2 = vld [vmem:[#allocation3 + $0x18] sm:$0xff] }
 0x17a   : > { %v772_v55 = vpop.permute.xlu0 %771 }
 0x17c   : > { %v774_v54 = vpop.permute.xlu1 %773 }
 0x17d   : > { %v776_v5 = vsel %vm775_vm5, %v772_v55, %v774_v54  ;;  %v780_v9 = vadd.f32 %v774_v54, %v692_v4  ;;  %v1344_v55 = vrot.slane %v1335_v46, %v1151_v22 }
 0x17e   : > { %v779_v11 = vadd.f32 %v776_v5, %v691_v7 }
 0x17f   : > { %v860_v57 = vpop.permute.xlu0 %859 }
 0x181   : > { %v862_v56 = vpop.permute.xlu1 %861 }
 0x182   : > { %v864_v10 = vsel %vm863_vm6, %v860_v57, %v862_v56  ;;  %v868_v13 = vadd.f32 %v862_v56, %v780_v9  ;;  %v1348_v57 = vrot.slane %v1335_v46, %v1347_v49  ;;  %vm1374_vm6 = vcmask 1043792  }
 0x183   : > { %v867_v16 = vadd.f32 %v864_v10, %v779_v11  ;;  %v2296_v11 = vld [vmem:[%s3293_s8] sm:$0x7] }
 0x18e   : > { %v948_v63 = vpop.permute.xlu0 %947 }
 0x190   : > { %v950_v59 = vpop.permute.xlu1 %949 }
 0x191   : > { %v952_v14 = vsel %vm951_vm7, %v948_v63, %v950_v59  ;;  %v956_v18 = vadd.f32 %v950_v59, %v868_v13  ;;  %vm1377_vm7 = vcmask 863232  }
 0x192   : > { %v955_v20 = vadd.f32 %v952_v14, %v867_v16 }
 0x193   : > { %v1036_v12 = vpop.permute.xlu0 %1035 }
 0x195   : > { %v1038_v8 = vpop.permute.xlu1 %1037 }
 0x196   : > { %v1040_v19 = vsel %vm1039_vm8, %v1036_v12, %v1038_v8  ;;  %v1044_v21 = vadd.f32 %v1038_v8, %v956_v18  ;;  %vm1470_vm8 = vcmask 392192  }
 0x197   : > { %v1043_v23 = vadd.f32 %v1040_v19, %v955_v20 }
 0x1a0   : > { %v1137_v25 = vpop.permute.xlu0 %1136 }
 0x1a2   : > { %v1124_v17 = vpop.permute.xlu1 %1123 }
 0x1a6   : > { %v1126_v24 = vpop.permute.xlu1 %1125 }
 0x1a7   : > { %v1128_v28 = vsel %vm1127_vm9, %v1124_v17, %v1126_v24  ;;  %v1132_v29 = vadd.f32 %v1126_v24, %v1044_v21  ;;  %vm1445_vm9 = vcmask 556032  }
 0x1a8   : > { %v1131_v30 = vadd.f32 %v1128_v28, %v1043_v23 }
 0x1a9   : > { %v1140_v31 = vadd.f32 %v1137_v25, %v1132_v29 }
 0x1aa   : > { %v1139_v33 = vadd.f32 %v1137_v25, %v1131_v30 }
 0x1ab   : > { %v1142_v35 = vmax.f32 %v1140_v31, 0.0 }
 0x1ac   : > { %v1141_v36 = vmax.f32 %v1139_v33, 0.0 }
 0x1ad   : > { %v1156_v37 = vmul.f32 %v1152_v32, %v1142_v35 }
 0x1ae   : > { %v1155_v38 = vmul.f32 %v1148_v34, %v1141_v36 }
 0x1af   : > { %1165 = vrot.lane.b32.xlu1 %v1156_v37, %s2637_s26  ;;  %v1480_v37 = vld [vmem:[%s3292_s7] sm:$0x7] }
 0x1b0   : > { %1163 = vrot.lane.b32.xlu0 %v1155_v38, %s2637_s26 }
 0x1b4   : > { %1184 = vperm.xlu0 %2617, %v1181_v39  }
 0x221   : > { %v1166_v40 = vpop.permute.xlu1 %1165 }
 0x222   : > { %1176 = vst.msk [vmem:[#allocation2 + $0x10] sm:$0xff] %vm1175_vm11, %v1166_v40  ;;  %v1164_v41 = vpop.permute.xlu0 %1163  ;;  %vm1424_vm11 = vcmask 719872  }
 0x223   : > { %v1168_v42 = vsel %vm1167_vm12, %v1164_v41, %v1166_v40  ;;  %1173 = vst.msk [vmem:[#allocation2] sm:$0xff] %vm1172_vm13, %v1164_v41  ;;  %v2465_v40 = vld [vmem:[%s3292_s7 + $0x4] sm:$0x7]  ;;  %v2468_v41 = vld [vmem:[%s3292_s7 + $0x8] sm:$0x7]  ;;  %vm2331_vm13 = vcmask 780928  }
 0x224   : > { %1221 = vmatprep.subr.mxu1 %v1168_v42  ;;  %v2471_v42 = vld [vmem:[%s3292_s7 + $0xc] sm:$0x7] }
 0x229   : > { %v1180_v45 = vld [vmem:[#allocation2 + $0x10] sm:$0xff] }
 0x22a   : > { %v1178_v44 = vld [vmem:[#allocation2] sm:$0xff] }
 0x22b   : > { %1222 = vmatpush1.msra.mxu1 %v1178_v44 }
 0x22c   : > { %2461 = vmatmul.mubr.msk.f32.vlgmr.msra.gmra.mxu1 %vm1187_vm14, %v1177_v43  ;;  %2512 = vmatprep.subr.mxu1 %v2627_v0 }
 0x22d   : > { %2513 = vmatpush3.msra.mxu1 %v1180_v45  ;;  %2514 = vmatprep.mubr.msk.f32.mxu1 %vm2638_vm10, %v2627_v0 }
 0x22f   : > { %v1185_v47 = vpop.permute.xlu0 %1184 }
 0x230   : > { %2515 = vmatmul.mubr.msk.f32.vlgmr.msra.gmra.mxu1 %vm1187_vm14, %v1177_v43  ;;  %v2474_v43 = vld [vmem:[%s3292_s7 + $0x10] sm:$0x7]  ;;  %vm2338_vm14 = vcmask 850944  }
 0x231   : > { %1564 = vmatprep.mubr.f32.mxu1 %v2627_v0 }
 0x2ec   : > { %v1257_v48 = vpop.f32.mrf.mxu1 }
 0x2ed   : > { %v1258_v50 = vadd.f32 %v1257_v48, %v1185_v47 }
 0x2ee   : > { %v1259_v52 = vpop.f32.mrf.mxu1 }
 0x2ef   : > { %v1332_v53 = vmax.f32 %v1258_v50, 0.0  ;;  %v1260_v54 = vadd.f32 %v1259_v52, %v1185_v47 }
 0x2f0   : > { %v1328_v56 = vpop.f32.mrf.mxu1 }
 0x2f1   : > { %v1352_v58 = vmul.f32 %v1340_v51, %v1332_v53  ;;  %v1333_v59 = vmax.f32 %v1260_v54, 0.0  ;;  %v1329_v60 = vadd.f32 %v1328_v56, %v1185_v47 }
 0x2f2   : > { %v2516_v61 = vpop.f32.mrf.mxu1 }
 0x2f3   : > { %v1353_v62 = vmul.f32 %v1344_v55, %v1333_v59  ;;  %v1334_v63 = vmax.f32 %v1329_v60, 0.0  ;;  %1363 = vrot.lane.b32.xlu1 %v1352_v58, %s2637_s26 }
 0x2f5   : > { %v1354_v1 = vmul.f32 %v1348_v57, %v1334_v63  ;;  %1365 = vrot.lane.b32.xlu0 %v1353_v62, %s2637_s26 }
 0x2f7   : > { %1367 = vrot.lane.b32.xlu1 %v1354_v1, %s2637_s26 }
 0x2f9   : > { %1468 = vrot.lane.b32.xlu0 %v1457_v2, %s2639_s18 }
 0x365   : > { %v1364_v3 = vpop.permute.xlu1 %1363 }
 0x366   : > { %1375 = vst.msk [vmem:[#allocation3] sm:$0xf] %vm1374_vm6, %v1364_v3 }
 0x367   : > { %v1366_v4 = vpop.permute.xlu0 %1365 }
 0x368   : > { %v1369_v5 = vsel %vm1167_vm12, %v1364_v3, %v1366_v4 }
 0x369   : > { %1376 = vst [vmem:[#allocation3 + $0x8] sm:$0xf] %v1369_v5  ;;  %v1368_v6 = vpop.permute.xlu1 %1367 }
 0x36a   : > { %v1370_v7 = vsel %vm1167_vm12, %v1366_v4, %v1368_v6  ;;  %vm1403_vm12 = vcmask 883712  }
 0x36b   : > { %1378 = vst.msk [vmem:[#allocation3 + $0x10] sm:$0xf] %vm1377_vm7, %v1370_v7  ;;  %v1469_v12 = vpop.permute.xlu0 %1468 }
 0x36d   : > { %v3042_v8 = vld [vmem:[#allocation3] sm:$0xff] }
 0x36e   : > { %1462 = vrot.lane.b32.xlu0 %v3042_v8, %s2639_s18  ;;  %1439 = vrot.lane.b32.xlu1 %v3042_v8, %s2640_s19 }
 0x370   : > { %v3047_v9 = vld [vmem:[#allocation3 + $0x8] sm:$0xff] }
 0x372   : > { %1464 = vrot.lane.b32.xlu0 %v3047_v9, %s2639_s18  ;;  %1441 = vrot.lane.b32.xlu1 %v3047_v9, %s2640_s19  ;;  %v1456_v10 = vld [vmem:[#allocation3 + $0x10] sm:$0xff] }
 0x373   : > { %1390 = vst.msk [vmem:[#allocation4 + $0x10] sm:$0xff] %vm1159_vm1, %v1456_v10 }
 0x376   : > { %1420 = vrot.lane.b32.xlu1 %v3047_v9, %s2641_s20  ;;  %1399 = vrot.lane.b32.xlu0 %v3047_v9, %s2642_s21 }
 0x37a   : > { %1466 = vrot.lane.b32.xlu1 %v1456_v10, %s2639_s18  ;;  %1443 = vrot.lane.b32.xlu0 %v1456_v10, %s2640_s19  ;;  %v3121_v39 = vld [vmem:[#allocation4 + $0x10] sm:$0xff] }
 0x37e   : > { %1418 = vrot.lane.b32.xlu1 %v3042_v8, %s2641_s20  ;;  %1422 = vrot.lane.b32.xlu0 %v1456_v10, %s2641_s20 }
 0x382   : > { %1397 = vrot.lane.b32.xlu0 %v3042_v8, %s2642_s21  ;;  %1401 = vrot.lane.b32.xlu1 %v1456_v10, %s2642_s21 }
 0x386   : > { %2299 = vperm.xlu1 %2618, %v2296_v11  }
 0x3e0   : > { %v1463_v13 = vpop.permute.xlu0 %1462  ;;  %v1440_v14 = vpop.permute.xlu1 %1439 }
 0x3e4   : > { %v1465_v15 = vpop.permute.xlu0 %1464  ;;  %v1442_v16 = vpop.permute.xlu1 %1441 }
 0x3e5   : > { %v3067_v17 = vsel %vm1470_vm8, %v1463_v13, %v1465_v15  ;;  %v3069_v18 = vsel %vm1445_vm9, %v1440_v14, %v1442_v16 }
 0x3e8   : > { %v1400_v19 = vpop.permute.xlu0 %1399  ;;  %v1421_v20 = vpop.permute.xlu1 %1420 }
 0x3ec   : > { %v1444_v21 = vpop.permute.xlu0 %1443  ;;  %v1467_v22 = vpop.permute.xlu1 %1466 }
 0x3ed   : > { %v3071_v23 = vsel %vm1445_vm9, %v1442_v16, %v1444_v21  ;;  %1453 = vst.msk [vmem:[#allocation4 + $0x58] sm:$0xff] %vm1159_vm1, %v1444_v21  ;;  %v3074_v24 = vsel %vm1470_vm8, %v1465_v15, %v1467_v22  ;;  %v1473_v25 = vsel %vm1470_vm8, %v1467_v22, %v1469_v12 }
 0x3ee   : > { %1479 = vst.msk [vmem:[#allocation4 + $0x70] sm:$0xff] %vm1159_vm1, %v1473_v25  ;;  %1522 = vmatprep.subr.mxu1 %v3074_v24 }
 0x3ef   : > { %1523 = vmatpush1.msra.mxu1 %v3067_v17 }
 0x3f0   : > { %v1423_v26 = vpop.permute.xlu0 %1422  ;;  %v1419_v27 = vpop.permute.xlu1 %1418  ;;  %1524 = vmatprep.subr.mxu1 %v3071_v23 }
 0x3f1   : > { %v3080_v28 = vsel %vm1424_vm11, %v1421_v20, %v1423_v26  ;;  %1432 = vst.msk [vmem:[#allocation4 + $0x40] sm:$0xff] %vm1159_vm1, %v1423_v26  ;;  %v3083_v29 = vsel %vm1424_vm11, %v1419_v27, %v1421_v20  ;;  %1525 = vmatpush1.msra.mxu1 %v3069_v18 }
 0x3f2   : > { %1526 = vmatprep.subr.mxu1 %v3080_v28 }
 0x3f3   : > { %1527 = vmatpush1.msra.mxu1 %v3083_v29 }
 0x3f4   : > { %v1398_v30 = vpop.permute.xlu0 %1397  ;;  %v1402_v31 = vpop.permute.xlu1 %1401  ;;  %v3098_v35 = vld [vmem:[#allocation4 + $0x58] sm:$0xff] }
 0x3f5   : > { %v3088_v32 = vsel %vm1403_vm12, %v1398_v30, %v1400_v19  ;;  %v3090_v33 = vsel %vm1403_vm12, %v1400_v19, %v1402_v31  ;;  %1411 = vst.msk [vmem:[#allocation4 + $0x28] sm:$0xff] %vm1159_vm1, %v1402_v31  ;;  %v3093_v34 = vld [vmem:[#allocation4 + $0x70] sm:$0xff]  ;;  %vm1496_vm1 = vcmask 326656  }
 0x3f6   : > { %2518 = vmatpush3.msra.mxu0 %v3093_v34  ;;  %1528 = vmatprep.subr.mxu1 %v3090_v33 }
 0x3f7   : > { %2519 = vmatprep.subr.mxu0 %v2627_v0  ;;  %1529 = vmatpush1.msra.mxu1 %v3088_v32 }
 0x3f8   : > { %2520 = vmatpush3.msra.mxu0 %v3098_v35  ;;  %v3102_v36 = vld [vmem:[#allocation4 + $0x40] sm:$0xff]  ;;  %1530 = vmatprep.subr.mxu1 %v3047_v9 }
 0x3f9   : > { %2521 = vmatprep.subr.mxu0 %v2627_v0  ;;  %1531 = vmatpush1.msra.mxu1 %v3042_v8 }
 0x3fa   : > { %2522 = vmatpush3.msra.mxu0 %v3102_v36  ;;  %1671 = vmatprep.subr.mxu1 %v3074_v24 }
 0x3fb   : > { %2523 = vmatprep.subr.mxu0 %v2627_v0  ;;  %2463 = vmatmul.mubr.msk.f32.vlgmr.msra.gmra.mxu1 %vm1496_vm1, %v1480_v37 }
 0x3fc   : > { %v3114_v38 = vld [vmem:[#allocation4 + $0x28] sm:$0xff]  ;;  %1672 = vmatpush1.msra.mxu1 %v3067_v17  ;;  %1713 = vmatprep.mubr.f32.mxu1 %v2627_v0 }
 0x3fd   : > { %2524 = vmatpush3.msra.mxu0 %v3114_v38  ;;  %1673 = vmatprep.subr.mxu1 %v3071_v23 }
 0x3fe   : > { %2525 = vmatprep.subr.mxu0 %v2627_v0  ;;  %1674 = vmatpush1.msra.mxu1 %v3069_v18 }
 0x3ff   : > { %2526 = vmatpush3.msra.mxu0 %v3121_v39  ;;  %1675 = vmatprep.subr.mxu1 %v3080_v28 }
 0x400   : > { %2530 = vmatprep.subr.mxu0 %v2627_v0  ;;  %2528 = vmatmul.mubr.msk.f32.vlgmr.msra.gmra.mxu0 %vm1496_vm1, %v1480_v37 }
 0x401   : > { %2531 = vmatpush3.msra.mxu0 %v3093_v34  ;;  %1676 = vmatpush1.msra.mxu1 %v3083_v29  ;;  %v2300_v1 = vpop.permute.xlu1 %2299 }
 0x402   : > { %2532 = vmatprep.subr.mxu0 %v2627_v0  ;;  %1677 = vmatprep.subr.mxu1 %v3090_v33 }
 0x403   : > { %2533 = vmatpush3.msra.mxu0 %v3098_v35  ;;  %1678 = vmatpush1.msra.mxu1 %v3088_v32 }
 0x404   : > { %2534 = vmatprep.subr.mxu0 %v2627_v0  ;;  %2540 = vmatprep.mubr.msk.f32.mxu0 %vm2638_vm10, %v2627_v0 }
 0x405   : > { %2535 = vmatpush3.msra.mxu0 %v3102_v36  ;;  %1679 = vmatprep.subr.mxu1 %v3047_v9 }
 0x406   : > { %2536 = vmatprep.subr.mxu0 %v2627_v0  ;;  %1680 = vmatpush1.msra.mxu1 %v3042_v8 }
 0x407   : > { %2537 = vmatpush3.msra.mxu0 %v3114_v38  ;;  %2466 = vmatmul.mubr.msk.f32.vlgmr.msra.gmra.mxu1 %vm1496_vm1, %v2465_v40 }
 0x408   : > { %2538 = vmatprep.subr.mxu0 %v2627_v0  ;;  %1834 = vmatprep.subr.mxu1 %v3074_v24 }
 0x409   : > { %2539 = vmatpush3.msra.mxu0 %v3121_v39  ;;  %1835 = vmatpush1.msra.mxu1 %v3067_v17 }
 0x40a   : > { %2541 = vmatmul.mubr.msk.f32.vlgmr.msra.gmra.mxu0 %vm1496_vm1, %v2465_v40  ;;  %2543 = vmatprep.subr.mxu0 %v2627_v0 }
 0x40b   : > { %2544 = vmatpush3.msra.mxu0 %v3093_v34  ;;  %1836 = vmatprep.subr.mxu1 %v3071_v23 }
 0x40c   : > { %2545 = vmatprep.subr.mxu0 %v2627_v0  ;;  %1837 = vmatpush1.msra.mxu1 %v3069_v18 }
 0x40d   : > { %2546 = vmatpush3.msra.mxu0 %v3098_v35  ;;  %1838 = vmatprep.subr.mxu1 %v3080_v28 }
 0x40e   : > { %2547 = vmatprep.subr.mxu0 %v2627_v0  ;;  %1839 = vmatpush1.msra.mxu1 %v3083_v29 }
 0x40f   : > { %2548 = vmatpush3.msra.mxu0 %v3102_v36  ;;  %1840 = vmatprep.subr.mxu1 %v3090_v33 }
 0x410   : > { %2549 = vmatprep.subr.mxu0 %v2627_v0  ;;  %1841 = vmatpush1.msra.mxu1 %v3088_v32 }
 0x411   : > { %2550 = vmatpush3.msra.mxu0 %v3114_v38  ;;  %2553 = vmatprep.mubr.msk.f32.mxu0 %vm2638_vm10, %v2627_v0 }
 0x412   : > { %2551 = vmatprep.subr.mxu0 %v2627_v0  ;;  %1842 = vmatprep.subr.mxu1 %v3047_v9 }
 0x413   : > { %2552 = vmatpush3.msra.mxu0 %v3121_v39  ;;  %1843 = vmatpush1.msra.mxu1 %v3042_v8 }
 0x414   : > { %2554 = vmatmul.mubr.msk.f32.vlgmr.msra.gmra.mxu0 %vm1496_vm1, %v2468_v41  ;;  %2556 = vmatprep.subr.mxu0 %v2627_v0 }
 0x415   : > { %1876 = vmatprep.mubr.f32.mxu1 %v2627_v0  ;;  %2557 = vmatpush3.msra.mxu0 %v3093_v34 }
 0x416   : > { %2469 = vmatmul.mubr.msk.f32.vlgmr.msra.gmra.mxu1 %vm1496_vm1, %v2468_v41  ;;  %1997 = vmatprep.subr.mxu1 %v3074_v24 }
 0x417   : > { %2558 = vmatprep.subr.mxu0 %v2627_v0  ;;  %1998 = vmatpush1.msra.mxu1 %v3067_v17 }
 0x418   : > { %2559 = vmatpush3.msra.mxu0 %v3098_v35  ;;  %1999 = vmatprep.subr.mxu1 %v3071_v23 }
 0x419   : > { %2560 = vmatprep.subr.mxu0 %v2627_v0  ;;  %2000 = vmatpush1.msra.mxu1 %v3069_v18 }
 0x41a   : > { %2561 = vmatpush3.msra.mxu0 %v3102_v36  ;;  %2001 = vmatprep.subr.mxu1 %v3080_v28 }
 0x41b   : > { %2562 = vmatprep.subr.mxu0 %v2627_v0  ;;  %2002 = vmatpush1.msra.mxu1 %v3083_v29 }
 0x41c   : > { %2563 = vmatpush3.msra.mxu0 %v3114_v38  ;;  %2003 = vmatprep.subr.mxu1 %v3090_v33 }
 0x41d   : > { %2564 = vmatprep.subr.mxu0 %v2627_v0  ;;  %2004 = vmatpush1.msra.mxu1 %v3088_v32 }
 0x41e   : > { %2565 = vmatpush3.msra.mxu0 %v3121_v39  ;;  %2566 = vmatprep.mubr.msk.f32.mxu0 %vm2638_vm10, %v2627_v0 }
 0x41f   : > { %2005 = vmatprep.subr.mxu1 %v3047_v9  ;;  %2567 = vmatmul.mubr.msk.f32.vlgmr.msra.gmra.mxu0 %vm1496_vm1, %v2471_v42 }
 0x420   : > { %2569 = vmatprep.subr.mxu0 %v2627_v0  ;;  %2006 = vmatpush1.msra.mxu1 %v3042_v8 }
 0x421   : > { %2039 = vmatprep.mubr.f32.mxu1 %v2627_v0  ;;  %2570 = vmatpush3.msra.mxu0 %v3093_v34 }
 0x422   : > { %2472 = vmatmul.mubr.msk.f32.vlgmr.msra.gmra.mxu1 %vm1496_vm1, %v2471_v42  ;;  %2160 = vmatprep.subr.mxu1 %v3074_v24 }
 0x423   : > { %2571 = vmatprep.subr.mxu0 %v2627_v0  ;;  %2161 = vmatpush1.msra.mxu1 %v3067_v17 }
 0x424   : > { %2572 = vmatpush3.msra.mxu0 %v3098_v35  ;;  %2162 = vmatprep.subr.mxu1 %v3071_v23 }
 0x425   : > { %2573 = vmatprep.subr.mxu0 %v2627_v0  ;;  %2163 = vmatpush1.msra.mxu1 %v3069_v18 }
 0x426   : > { %2574 = vmatpush3.msra.mxu0 %v3102_v36  ;;  %2164 = vmatprep.subr.mxu1 %v3080_v28 }
 0x427   : > { %2575 = vmatprep.subr.mxu0 %v2627_v0  ;;  %2165 = vmatpush1.msra.mxu1 %v3083_v29 }
 0x428   : > { %2576 = vmatpush3.msra.mxu0 %v3114_v38  ;;  %2166 = vmatprep.subr.mxu1 %v3090_v33 }
 0x429   : > { %2577 = vmatprep.subr.mxu0 %v2627_v0  ;;  %2167 = vmatpush1.msra.mxu1 %v3088_v32 }
 0x42a   : > { %2578 = vmatpush3.msra.mxu0 %v3121_v39  ;;  %2579 = vmatprep.mubr.msk.f32.mxu0 %vm2638_vm10, %v2627_v0  ;;  %vm2326_vm10 = vcmask 649728  }
 0x42b   : > { %2168 = vmatprep.subr.mxu1 %v3047_v9  ;;  %2580 = vmatmul.mubr.msk.f32.vlgmr.msra.gmra.mxu0 %vm1496_vm1, %v2474_v43 }
 0x42c   : > { %2169 = vmatpush1.msra.mxu1 %v3042_v8  ;;  %2202 = vmatprep.mubr.f32.mxu1 %v2627_v0 }
 0x42d   : > { %2475 = vmatmul.mubr.msk.f32.vlgmr.msra.gmra.mxu1 %vm1496_vm1, %v2474_v43 }
 0x4bb   : > { %v1566_v44 = vpop.f32.mrf.mxu1 }
 0x4bd   : > { %v1568_v47 = vpop.f32.mrf.mxu1 }
 0x4c0   : > { %v1637_v45 = vpop.f32.mrf.mxu0 }
 0x4c2   : > { %v2529_v46 = vpop.f32.mrf.mxu0 }
 0x4c7   : > { %v1715_v48 = vpop.f32.mrf.mxu1 }
 0x4c8   : > { %1793 = vrot.lane.b32.xlu1 %v1715_v48, %s2629_s14 }
 0x4c9   : > { %v1717_v49 = vpop.f32.mrf.mxu1 }
 0x4ca   : > { %v1786_v50 = vpop.f32.mrf.mxu0 }
 0x4cb   : > { %1797 = vrot.lane.b32.xlu0 %v1786_v50, %s2629_s14 }
 0x4cc   : > { %v2542_v51 = vpop.f32.mrf.mxu0  ;;  %1795 = vrot.lane.b32.xlu1 %v1717_v49, %s2629_s14  ;;  %s2643_s14 = smov 72  }
 0x4d4   : > { %v1949_v52 = vpop.f32.mrf.mxu0 }
 0x4d5   : > { %1960 = vrot.lane.b32.xlu1 %v1949_v52, %s2630_s15 }
 0x4d6   : > { %v1878_v0 = vpop.f32.mrf.mxu1  ;;  %v2555_v53 = vpop.f32.mrf.mxu0 }
 0x4d7   : > { %1956 = vrot.lane.b32.xlu0 %v1878_v0, %s2630_s15 }
 0x4d8   : > { %v1880_v54 = vpop.f32.mrf.mxu1 }
 0x4db   : > { %1958 = vrot.lane.b32.xlu0 %v1880_v54, %s2630_s15  ;;  %s2644_s15 = smov 76  }
 0x4df   : > { %v2112_v55 = vpop.f32.mrf.mxu0 }
 0x4e0   : > { %2123 = vrot.lane.b32.xlu0 %v2112_v55, %s2631_s16 }
 0x4e1   : > { %v2568_v56 = vpop.f32.mrf.mxu0 }
 0x4e2   : > { %v2041_v57 = vpop.f32.mrf.mxu1 }
 0x4e4   : > { %v2043_v58 = vpop.f32.mrf.mxu1  ;;  %2119 = vrot.lane.b32.xlu0 %v2041_v57, %s2631_s16 }
 0x4e5   : > { %2121 = vrot.lane.b32.xlu1 %v2043_v58, %s2631_s16  ;;  %s2479_s16 = sshll.u32 %s3296_s10, 3  ;;  %s2647_s10 = smov 112  }
 0x4e6   : > { %s3257_s27 = scalar_lea.vmem %s3294_s9, %s2479_s16 }
 0x4eb   : > { %v2275_v59 = vpop.f32.mrf.mxu0 }
 0x4ec   : > { %2286 = vrot.lane.b32.xlu0 %v2275_v59, %s2632_s17 }
 0x4ed   : > { %v2204_v60 = vpop.f32.mrf.mxu1  ;;  %v2581_v61 = vpop.f32.mrf.mxu0 }
 0x4ef   : > { %v2206_v62 = vpop.f32.mrf.mxu1 }
 0x4f0   : > { %2284 = vrot.lane.b32.xlu1 %v2206_v62, %s2632_s17 }
 0x4f4   : > { %2282 = vrot.lane.b32.xlu1 %v2204_v60, %s2632_s17 }
 0x53a   : > { %v1794_v3 = vpop.permute.xlu1 %1793 }
 0x53d   : > { %v1798_v63 = vpop.permute.xlu0 %1797 }
 0x53e   : > { %v1796_v5 = vpop.permute.xlu1 %1795  ;;  %v1806_v8 = vadd.f32 %v1798_v63, %v1637_v45 }
 0x53f   : > { %v1800_v10 = vsel %vm511_vm2, %v1796_v5, %v1798_v63  ;;  %v1799_v17 = vsel %vm511_vm2, %v1794_v3, %v1796_v5  ;;  %vm2305_vm2 = vcmask 124928  }
 0x540   : > { %v1805_v15 = vadd.f32 %v1800_v10, %v1568_v47  ;;  %v1804_v23 = vadd.f32 %v1799_v17, %v1566_v44 }
 0x547   : > { %v1961_v7 = vpop.permute.xlu1 %1960 }
 0x548   : > { %v1969_v11 = vadd.f32 %v1961_v7, %v1806_v8 }
 0x549   : > { %v1957_v2 = vpop.permute.xlu0 %1956 }
 0x54d   : > { %v1959_v4 = vpop.permute.xlu0 %1958 }
 0x54e   : > { %v1963_v13 = vsel %vm599_vm3, %v1959_v4, %v1961_v7  ;;  %v1962_v21 = vsel %vm599_vm3, %v1957_v2, %v1959_v4  ;;  %vm2311_vm3 = vcmask 256128  }
 0x54f   : > { %v1968_v20 = vadd.f32 %v1963_v13, %v1805_v15  ;;  %v1967_v28 = vadd.f32 %v1962_v21, %v1804_v23 }
 0x552   : > { %v2124_v6 = vpop.permute.xlu0 %2123 }
 0x553   : > { %v2132_v14 = vadd.f32 %v2124_v6, %v1969_v11 }
 0x556   : > { %v2120_v9 = vpop.permute.xlu0 %2119 }
 0x557   : > { %v2122_v12 = vpop.permute.xlu1 %2121 }
 0x558   : > { %v2126_v18 = vsel %vm687_vm4, %v2122_v12, %v2124_v6  ;;  %v2125_v26 = vsel %vm687_vm4, %v2120_v9, %v2122_v12  ;;  %vm2316_vm4 = vcmask 387328  }
 0x559   : > { %v2131_v24 = vadd.f32 %v2126_v18, %v1968_v20  ;;  %v2130_v30 = vadd.f32 %v2125_v26, %v1967_v28 }
 0x55e   : > { %v2287_v16 = vpop.permute.xlu0 %2286 }
 0x55f   : > { %v2295_v19 = vadd.f32 %v2287_v16, %v2132_v14 }
 0x561   : > { %v2304_v22 = vadd.f32 %v2300_v1, %v2295_v19 }
 0x562   : > { %v2285_v25 = vpop.permute.xlu1 %2284 }
 0x563   : > { %v2289_v27 = vsel %vm775_vm5, %v2285_v25, %v2287_v16  ;;  %2373 = vrot.lane.b32.xlu0 %v2304_v22, %s2643_s14  ;;  %2369 = vrot.lane.b32.xlu1 %v2304_v22, %s2644_s15 }
 0x564   : > { %v2294_v29 = vadd.f32 %v2289_v27, %v2131_v24 }
 0x566   : > { %v2303_v31 = vadd.f32 %v2300_v1, %v2294_v29  ;;  %v2283_v32 = vpop.permute.xlu1 %2282 }
 0x567   : > { %v2288_v33 = vsel %vm775_vm5, %v2283_v32, %v2285_v25  ;;  %vm2321_vm5 = vcmask 518528  }
 0x568   : > { %v2293_v34 = vadd.f32 %v2288_v33, %v2130_v30  ;;  %2348 = vrot.lane.b32.xlu0 %v2303_v31, %s2645_s24 }
 0x56a   : > { %v2302_v35 = vadd.f32 %v2300_v1, %v2293_v34 }
 0x56c   : > { %2352 = vrot.lane.b32.xlu0 %v2303_v31, %s2646_s28  ;;  %2308 = vrot.lane.b32.xlu1 %v2302_v35, %s2632_s17  ;;  %2306 = vst.msk [vmem:[%s3257_s27] sm:$0x7] %vm2305_vm2, %v2302_v35  ;;  %v2334_v36 = vcombine.low %v2302_v35, %v2303_v31  ;;  %s2651_s17 = smov 104  }
 0x570   : > { %2356 = vrot.lane.b32.xlu0 %v2303_v31, %s2641_s20  ;;  %2313 = vrot.lane.b32.xlu1 %v2302_v35, %s2636_s23  ;;  %s2652_s20 = smov 100  }
 0x574   : > { %2323 = vrot.lane.b32.xlu0 %v2302_v35, %s2647_s10  ;;  %2318 = vrot.lane.b32.xlu1 %v2302_v35, %s2648_s29 }
 0x578   : > { %2328 = vrot.lane.b32.xlu0 %v2302_v35, %s2642_s21  ;;  %2360 = vrot.lane.b32.xlu1 %v2303_v31, %s2649_s11 }
 0x57c   : > { %2364 = vrot.lane.b32.xlu1 %v2303_v31, %s2650_s12  ;;  %2335 = vrot.lane.b32.xlu0 %v2334_v36, %s2651_s17 }
 0x580   : > { %2343 = vrot.lane.b32.xlu1 %v2303_v31, %s2652_s20  ;;  %2377 = vrot.lane.b32.xlu0 %v2304_v22, %s2640_s19 }
 0x5d5   : > { %v2374_v37 = vpop.permute.xlu0 %2373  ;;  %v2370_v38 = vpop.permute.xlu1 %2369 }
 0x5da   : > { %v2349_v39 = vpop.permute.xlu0 %2348 }
 0x5db   : > { %2351 = vst.msk [vmem:[%s3257_s27 + $0x4] sm:$0x7] %vm2305_vm2, %v2349_v39 }
 0x5de   : > { %v2353_v40 = vpop.permute.xlu0 %2352  ;;  %v2309_v41 = vpop.permute.xlu1 %2308 }
 0x5df   : > { %2355 = vst.msk [vmem:[%s3257_s27 + $0x4] sm:$0x7] %vm2311_vm3, %v2353_v40  ;;  %2312 = vst.msk [vmem:[%s3257_s27] sm:$0x7] %vm2311_vm3, %v2309_v41 }
 0x5e2   : > { %v2357_v42 = vpop.permute.xlu0 %2356  ;;  %v2314_v43 = vpop.permute.xlu1 %2313 }
 0x5e3   : > { %2359 = vst.msk [vmem:[%s3257_s27 + $0x4] sm:$0x7] %vm2316_vm4, %v2357_v42  ;;  %2317 = vst.msk [vmem:[%s3257_s27] sm:$0x7] %vm2316_vm4, %v2314_v43 }
 0x5e6   : > { %v2324_v44 = vpop.permute.xlu0 %2323  ;;  %v2319_v45 = vpop.permute.xlu1 %2318 }
 0x5e7   : > { %2322 = vst.msk [vmem:[%s3257_s27] sm:$0x7] %vm2321_vm5, %v2319_v45 }
 0x5e8   : > { %2327 = vst.msk [vmem:[%s3257_s27] sm:$0x7] %vm2326_vm10, %v2324_v44 }
 0x5ea   : > { %v2329_v46 = vpop.permute.xlu0 %2328  ;;  %v2361_v47 = vpop.permute.xlu1 %2360 }
 0x5eb   : > { %2332 = vst.msk [vmem:[%s3257_s27] sm:$0x7] %vm2331_vm13, %v2329_v46 }
 0x5ec   : > { %2363 = vst.msk [vmem:[%s3257_s27 + $0x4] sm:$0x7] %vm2321_vm5, %v2361_v47 }
 0x5ee   : > { %v2336_v48 = vpop.permute.xlu0 %2335  ;;  %v2365_v49 = vpop.permute.xlu1 %2364 }
 0x5ef   : > { %v2337_v50 = vrot.slane %v2336_v48, 4  ;;  %2367 = vst.msk [vmem:[%s3257_s27 + $0x4] sm:$0x7] %vm2326_vm10, %v2365_v49 }
 0x5f0   : > { %2372 = vst.msk [vmem:[%s3257_s27 + $0x4] sm:$0x7] %vm2331_vm13, %v2370_v38 }
 0x5f1   : > { %v2339_v51 = vsel %vm2338_vm14, %v2336_v48, %v2337_v50  ;;  %2376 = vst.msk [vmem:[%s3257_s27 + $0x4] sm:$0x7] %vm2341_vm15, %v2374_v37 }
 0x5f2   : > { %2342 = vst.msk [vmem:[%s3257_s27] sm:$0x7] %vm2341_vm15, %v2339_v51  ;;  %v2378_v52 = vpop.permute.xlu0 %2377  ;;  %v2344_v0 = vpop.permute.xlu1 %2343 }
 0x5f3   : > { %2380 = vst.msk [vmem:[%s3257_s27 + $0x4] sm:$0x7] %vm2346_vm0, %v2378_v52  ;;  %2347 = vst.msk [vmem:[%s3257_s27] sm:$0x7] %vm2346_vm0, %v2344_v0 }
 0x5f4 PF: > { %s19_s30 = sadd.s32 1, %s2625_s30  }
 0x5f5   : > { %p16_p4 = scmp.ge.s32.totalorder %s19_s30, 4  }
 0x5f7   :  { %18 = sbr.rel (!%p16_p4) target bundleno = 1 (0x1), region = 98 }

</bundles_post_ra>
